<compile_context>
chip_gen: v7x
topology: tpu7x:2x2x1
jax: 0.10.0
libtpu: 0.0.40
codegen_flags: <defaults>
</compile_context>

<pallas_src>
import jax
import jax.numpy as jnp
from jax.experimental import pallas as pl
from jax.experimental.pallas import tpu as pltpu


# ---------------------------------------------------------------------------
# Fused kernel: 3-layer LSTM + sum-over-time + Linear + tanh
# ---------------------------------------------------------------------------
def lstm_net_kernel(x_ref,
                    wih0_ref, whh0_ref, b0_ref,
                    wih1_ref, whh1_ref, b1_ref,
                    wih2_ref, whh2_ref, b2_ref,
                    fcw_ref, fcb_ref,
                    h0_ref, c0_ref,
                    out_ref):
    _, B, H = h0_ref.shape          # (num_layers, B, H)
    TB = x_ref.shape[0]             # x is pre-flattened to (T*B, I) in wrapper
    T = TB // B

    def recurrence(gxs, whh_ref, layer):
        """One LSTM layer given precomputed input projections gxs[t] = (B, 4H)."""
        whh = whh_ref[...]          # (H, 4H); loaded once, reused by all steps
        h = h0_ref[layer]           # (B, H)
        c = c0_ref[layer]           # (B, H)
        hs = []
        for t in range(T):          # T static & tiny -> fully unrolled
            # Only h @ W_hh sits on the carried (serial) dependency chain.
            gates = gxs[t] + jnp.dot(h, whh,
                                     preferred_element_type=jnp.float32)
            # One sigmoid + one tanh over the whole (B, 4H) pre-activation.
            sig = jax.nn.sigmoid(gates)
            tah = jnp.tanh(gates)
            i_g = sig[:, 0 * H:1 * H]       # PyTorch gate order: i, f, g, o
            f_g = sig[:, 1 * H:2 * H]
            g_g = tah[:, 2 * H:3 * H]
            o_g = sig[:, 3 * H:4 * H]
            c = f_g * c + i_g * g_g
            h = o_g * jnp.tanh(c)
            hs.append(h)
        return hs

    # ---- Layer 0: hoisted input projection, one fat (T*B, I) @ (I, 4H) matmul
    #      with the (b_ih + b_hh) bias folded in once.
    gx0 = (jnp.dot(x_ref[...], wih0_ref[...],
                   preferred_element_type=jnp.float32) + b0_ref[...])
    hs0 = recurrence([gx0[t * B:(t + 1) * B, :] for t in range(T)],
                     whh0_ref, 0)

    # ---- Layers 1 & 2: input projections depend only on the previous layer's
    #      finished outputs, so they are off the recurrence critical path.
    wih1 = wih1_ref[...]
    b1 = b1_ref[...]
    gx1 = [jnp.dot(h, wih1, preferred_element_type=jnp.float32) + b1
           for h in hs0]
    hs1 = recurrence(gx1, whh1_ref, 1)

    wih2 = wih2_ref[...]
    b2 = b2_ref[...]
    gx2 = [jnp.dot(h, wih2, preferred_element_type=jnp.float32) + b2
           for h in hs1]
    hs2 = recurrence(gx2, whh2_ref, 2)

    # ---- output.sum(0) fused with Linear(hidden, 60) + tanh.
    acc = hs2[0]
    for t in range(1, T):
        acc = acc + hs2[t]
    out_ref[...] = jnp.tanh(
        jnp.dot(acc, fcw_ref[...], preferred_element_type=jnp.float32)
        + fcb_ref[...])


# ---------------------------------------------------------------------------
# Wrapper
# ---------------------------------------------------------------------------
def lstm_net_forward(x, params, h0, c0):
    """x: (T, B, input_size); h0/c0: (3, B, hidden_size). Returns (B, 60)."""
    T, B, I = x.shape
    O = params["fc_w_t"].shape[-1]
    w0, u0, b0 = params["layer0"]
    w1, u1, b1 = params["layer1"]
    w2, u2, b2 = params["layer2"]
    x_flat = x.reshape(T * B, I)    # layout plumbing in the wrapper, not in-kernel

    vmem = pl.BlockSpec(memory_space=pltpu.MemorySpace.VMEM)
    return pl.pallas_call(
        lstm_net_kernel,
        out_shape=jax.ShapeDtypeStruct((B, O), jnp.float32),
        in_specs=[vmem] * 14,       # whole arrays resident in VMEM (tiny)
        out_specs=vmem,
    )(x_flat, w0, u0, b0, w1, u1, b1, w2, u2, b2,
      params["fc_w_t"], params["fc_b"], h0, c0)


# ---------------------------------------------------------------------------
# Pure-JAX reference (for correctness check)
# ---------------------------------------------------------------------------
def lstm_net_reference(x, params, h0, c0):
    y = x
    for l in range(3):
        wih_t, whh_t, bias = params[f"layer{l}"]
        H = h0.shape[-1]
        h, c = h0[l], c0[l]
        outs = []
        for t in range(y.shape[0]):
            gates = y[t] @ wih_t + h @ whh_t + bias[0]
            i_g = jax.nn.sigmoid(gates[:, 0 * H:1 * H])
            f_g = jax.nn.sigmoid(gates[:, 1 * H:2 * H])
            g_g = jnp.tanh(gates[:, 2 * H:3 * H])
            o_g = jax.nn.sigmoid(gates[:, 3 * H:4 * H])
            c = f_g * c + i_g * g_g
            h = o_g * jnp.tanh(c)
            outs.append(h)
        y = jnp.stack(outs, axis=0)
    return jnp.tanh(y.sum(0) @ params["fc_w_t"] + params["fc_b"][0])


# ---------------------------------------------------------------------------
# Parameter init (deterministic, PyTorch-style uniform(-1/sqrt(H), 1/sqrt(H)))
# ---------------------------------------------------------------------------
def init_params(key, input_size, hidden_size, out_size=60):
    params = {}
    bound = 1.0 / jnp.sqrt(jnp.float32(hidden_size))
    for l in range(3):
        in_dim = input_size if l == 0 else hidden_size
        key, k1, k2, k3, k4 = jax.random.split(key, 5)
        w_ih = jax.random.uniform(k1, (4 * hidden_size, in_dim),
                                  jnp.float32, -bound, bound)
        w_hh = jax.random.uniform(k2, (4 * hidden_size, hidden_size),
                                  jnp.float32, -bound, bound)
        b_ih = jax.random.uniform(k3, (4 * hidden_size,),
                                  jnp.float32, -bound, bound)
        b_hh = jax.random.uniform(k4, (4 * hidden_size,),
                                  jnp.float32, -bound, bound)
        # pre-transposed weights + summed bias, PyTorch gate order (i, f, g, o)
        params[f"layer{l}"] = (w_ih.T, w_hh.T, (b_ih + b_hh)[None, :])
    key, k5, k6 = jax.random.split(key, 3)
    fc_bound = 1.0 / jnp.sqrt(jnp.float32(hidden_size))
    w_fc = jax.random.uniform(k5, (out_size, hidden_size),
                              jnp.float32, -fc_bound, fc_bound)
    b_fc = jax.random.uniform(k6, (out_size,),
                              jnp.float32, -fc_bound, fc_bound)
    params["fc_w_t"] = w_fc.T
    params["fc_b"] = b_fc[None, :]
    return params, key


# ---------------------------------------------------------------------------
if __name__ == "__main__":
    INPUT_SIZE = 16
    HIDDEN_SIZE = 32
    SEQ_LEN = 8
    BATCH = 2

    key = jax.random.PRNGKey(0)
    params, key = init_params(key, INPUT_SIZE, HIDDEN_SIZE)

    key, kx, kh, kc = jax.random.split(key, 4)
    x = jax.random.normal(kx, (SEQ_LEN, BATCH, INPUT_SIZE), jnp.float32)
    # torch.randn h0/c0 in forward -> deterministic normals here
    h0 = jax.random.normal(kh, (3, BATCH, HIDDEN_SIZE), jnp.float32)
    c0 = jax.random.normal(kc, (3, BATCH, HIDDEN_SIZE), jnp.float32)

    fwd = jax.jit(lstm_net_forward)
    out = fwd(x, params, h0, c0)
    out = jax.block_until_ready(out)

    ref = lstm_net_reference(x, params, h0, c0)
    assert out.shape == (BATCH, 60), out.shape
    assert jnp.allclose(out, ref, atol=2e-5, rtol=2e-5), (
        float(jnp.max(jnp.abs(out - ref))))

    print("KERNEL_OK")
</pallas_src>

<mosaic_0001>
module attributes {stable_mosaic.version = 11 : i64} {
  func.func @lstm_net_kernel(%arg0: memref<16x16xf32, #tpu.memory_space<vmem>>, %arg1: memref<16x128xf32, #tpu.memory_space<vmem>>, %arg2: memref<32x128xf32, #tpu.memory_space<vmem>>, %arg3: memref<1x128xf32, #tpu.memory_space<vmem>>, %arg4: memref<32x128xf32, #tpu.memory_space<vmem>>, %arg5: memref<32x128xf32, #tpu.memory_space<vmem>>, %arg6: memref<1x128xf32, #tpu.memory_space<vmem>>, %arg7: memref<32x128xf32, #tpu.memory_space<vmem>>, %arg8: memref<32x128xf32, #tpu.memory_space<vmem>>, %arg9: memref<1x128xf32, #tpu.memory_space<vmem>>, %arg10: memref<32x60xf32, #tpu.memory_space<vmem>>, %arg11: memref<1x60xf32, #tpu.memory_space<vmem>>, %arg12: memref<3x2x32xf32, #tpu.memory_space<vmem>>, %arg13: memref<3x2x32xf32, #tpu.memory_space<vmem>>, %arg14: memref<2x60xf32, #tpu.memory_space<vmem>>) attributes {dimension_semantics = [], scalar_prefetch = 0 : i64, scratch_operands = 0 : i64, tpu.core_type = #tpu.core_type<tc>} {
    %c0 = arith.constant 0 : index
    %c0_0 = arith.constant 0 : index
    %0 = vector.load %arg0[%c0, %c0_0] : memref<16x16xf32, #tpu.memory_space<vmem>>, vector<16x16xf32>
    %c0_1 = arith.constant 0 : index
    %c0_2 = arith.constant 0 : index
    %1 = vector.load %arg1[%c0_1, %c0_2] : memref<16x128xf32, #tpu.memory_space<vmem>>, vector<16x128xf32>
    %cst = arith.constant dense<0.000000e+00> : vector<16x128xf32>
    %2 = tpu.matmul %0, %1, %cst {dimension_numbers = #tpu.dot_dimension_numbers<[1], [0], [0], [1], [0, 0, 1, 1], [], []>} : vector<16x16xf32>, vector<16x128xf32>, vector<16x128xf32> -> vector<16x128xf32>
    %c0_3 = arith.constant 0 : index
    %c0_4 = arith.constant 0 : index
    %3 = vector.load %arg3[%c0_3, %c0_4] : memref<1x128xf32, #tpu.memory_space<vmem>>, vector<1x128xf32>
    %4 = vector.broadcast %3 : vector<1x128xf32> to vector<16x128xf32>
    %5 = arith.addf %2, %4 : vector<16x128xf32>
    %6 = vector.extract_strided_slice %5 {offsets = [0, 0], sizes = [2, 128], strides = [1, 1]} : vector<16x128xf32> to vector<2x128xf32>
    %7 = vector.extract_strided_slice %5 {offsets = [2, 0], sizes = [2, 128], strides = [1, 1]} : vector<16x128xf32> to vector<2x128xf32>
    %8 = vector.extract_strided_slice %5 {offsets = [4, 0], sizes = [2, 128], strides = [1, 1]} : vector<16x128xf32> to vector<2x128xf32>
    %9 = vector.extract_strided_slice %5 {offsets = [6, 0], sizes = [2, 128], strides = [1, 1]} : vector<16x128xf32> to vector<2x128xf32>
    %10 = vector.extract_strided_slice %5 {offsets = [8, 0], sizes = [2, 128], strides = [1, 1]} : vector<16x128xf32> to vector<2x128xf32>
    %11 = vector.extract_strided_slice %5 {offsets = [10, 0], sizes = [2, 128], strides = [1, 1]} : vector<16x128xf32> to vector<2x128xf32>
    %12 = vector.extract_strided_slice %5 {offsets = [12, 0], sizes = [2, 128], strides = [1, 1]} : vector<16x128xf32> to vector<2x128xf32>
    %13 = vector.extract_strided_slice %5 {offsets = [14, 0], sizes = [2, 128], strides = [1, 1]} : vector<16x128xf32> to vector<2x128xf32>
    %c0_5 = arith.constant 0 : index
    %c0_6 = arith.constant 0 : index
    %14 = vector.load %arg2[%c0_5, %c0_6] : memref<32x128xf32, #tpu.memory_space<vmem>>, vector<32x128xf32>
    %c0_7 = arith.constant 0 : index
    %c0_8 = arith.constant 0 : index
    %c0_9 = arith.constant 0 : index
    %15 = vector.load %arg12[%c0_7, %c0_8, %c0_9] : memref<3x2x32xf32, #tpu.memory_space<vmem>>, vector<1x2x32xf32>
    %16 = vector.shape_cast %15 : vector<1x2x32xf32> to vector<2x32xf32>
    %c0_10 = arith.constant 0 : index
    %c0_11 = arith.constant 0 : index
    %c0_12 = arith.constant 0 : index
    %17 = vector.load %arg13[%c0_10, %c0_11, %c0_12] : memref<3x2x32xf32, #tpu.memory_space<vmem>>, vector<1x2x32xf32>
    %18 = vector.shape_cast %17 : vector<1x2x32xf32> to vector<2x32xf32>
    %cst_13 = arith.constant dense<0.000000e+00> : vector<2x128xf32>
    %19 = tpu.matmul %16, %14, %cst_13 {dimension_numbers = #tpu.dot_dimension_numbers<[1], [0], [0], [1], [0, 0, 1, 1], [], []>} : vector<2x32xf32>, vector<32x128xf32>, vector<2x128xf32> -> vector<2x128xf32>
    %20 = arith.addf %6, %19 : vector<2x128xf32>
    %21 = arith.negf %20 : vector<2x128xf32>
    %22 = math.exp %21 : vector<2x128xf32>
    %cst_14 = arith.constant 1.000000e+00 : f32
    %23 = vector.broadcast %cst_14 : f32 to vector<2x128xf32>
    %24 = arith.addf %23, %22 : vector<2x128xf32>
    %25 = arith.divf %23, %24 : vector<2x128xf32>
    %26 = math.tanh %20 : vector<2x128xf32>
    %27 = vector.extract_strided_slice %25 {offsets = [0, 0], sizes = [2, 32], strides = [1, 1]} : vector<2x128xf32> to vector<2x32xf32>
    %28 = vector.extract_strided_slice %25 {offsets = [0, 32], sizes = [2, 32], strides = [1, 1]} : vector<2x128xf32> to vector<2x32xf32>
    %29 = vector.extract_strided_slice %26 {offsets = [0, 64], sizes = [2, 32], strides = [1, 1]} : vector<2x128xf32> to vector<2x32xf32>
    %30 = vector.extract_strided_slice %25 {offsets = [0, 96], sizes = [2, 32], strides = [1, 1]} : vector<2x128xf32> to vector<2x32xf32>
    %31 = arith.mulf %28, %18 : vector<2x32xf32>
    %32 = arith.mulf %27, %29 : vector<2x32xf32>
    %33 = arith.addf %31, %32 : vector<2x32xf32>
    %34 = math.tanh %33 : vector<2x32xf32>
    %35 = arith.mulf %30, %34 : vector<2x32xf32>
    %cst_15 = arith.constant dense<0.000000e+00> : vector<2x128xf32>
    %36 = tpu.matmul %35, %14, %cst_15 {dimension_numbers = #tpu.dot_dimension_numbers<[1], [0], [0], [1], [0, 0, 1, 1], [], []>} : vector<2x32xf32>, vector<32x128xf32>, vector<2x128xf32> -> vector<2x128xf32>
    %37 = arith.addf %7, %36 : vector<2x128xf32>
    %38 = arith.negf %37 : vector<2x128xf32>
    %39 = math.exp %38 : vector<2x128xf32>
    %cst_16 = arith.constant 1.000000e+00 : f32
    %40 = vector.broadcast %cst_16 : f32 to vector<2x128xf32>
    %41 = arith.addf %40, %39 : vector<2x128xf32>
    %42 = arith.divf %40, %41 : vector<2x128xf32>
    %43 = math.tanh %37 : vector<2x128xf32>
    %44 = vector.extract_strided_slice %42 {offsets = [0, 0], sizes = [2, 32], strides = [1, 1]} : vector<2x128xf32> to vector<2x32xf32>
    %45 = vector.extract_strided_slice %42 {offsets = [0, 32], sizes = [2, 32], strides = [1, 1]} : vector<2x128xf32> to vector<2x32xf32>
    %46 = vector.extract_strided_slice %43 {offsets = [0, 64], sizes = [2, 32], strides = [1, 1]} : vector<2x128xf32> to vector<2x32xf32>
    %47 = vector.extract_strided_slice %42 {offsets = [0, 96], sizes = [2, 32], strides = [1, 1]} : vector<2x128xf32> to vector<2x32xf32>
    %48 = arith.mulf %45, %33 : vector<2x32xf32>
    %49 = arith.mulf %44, %46 : vector<2x32xf32>
    %50 = arith.addf %48, %49 : vector<2x32xf32>
    %51 = math.tanh %50 : vector<2x32xf32>
    %52 = arith.mulf %47, %51 : vector<2x32xf32>
    %cst_17 = arith.constant dense<0.000000e+00> : vector<2x128xf32>
    %53 = tpu.matmul %52, %14, %cst_17 {dimension_numbers = #tpu.dot_dimension_numbers<[1], [0], [0], [1], [0, 0, 1, 1], [], []>} : vector<2x32xf32>, vector<32x128xf32>, vector<2x128xf32> -> vector<2x128xf32>
    %54 = arith.addf %8, %53 : vector<2x128xf32>
    %55 = arith.negf %54 : vector<2x128xf32>
    %56 = math.exp %55 : vector<2x128xf32>
    %cst_18 = arith.constant 1.000000e+00 : f32
    %57 = vector.broadcast %cst_18 : f32 to vector<2x128xf32>
    %58 = arith.addf %57, %56 : vector<2x128xf32>
    %59 = arith.divf %57, %58 : vector<2x128xf32>
    %60 = math.tanh %54 : vector<2x128xf32>
    %61 = vector.extract_strided_slice %59 {offsets = [0, 0], sizes = [2, 32], strides = [1, 1]} : vector<2x128xf32> to vector<2x32xf32>
    %62 = vector.extract_strided_slice %59 {offsets = [0, 32], sizes = [2, 32], strides = [1, 1]} : vector<2x128xf32> to vector<2x32xf32>
    %63 = vector.extract_strided_slice %60 {offsets = [0, 64], sizes = [2, 32], strides = [1, 1]} : vector<2x128xf32> to vector<2x32xf32>
    %64 = vector.extract_strided_slice %59 {offsets = [0, 96], sizes = [2, 32], strides = [1, 1]} : vector<2x128xf32> to vector<2x32xf32>
    %65 = arith.mulf %62, %50 : vector<2x32xf32>
    %66 = arith.mulf %61, %63 : vector<2x32xf32>
    %67 = arith.addf %65, %66 : vector<2x32xf32>
    %68 = math.tanh %67 : vector<2x32xf32>
    %69 = arith.mulf %64, %68 : vector<2x32xf32>
    %cst_19 = arith.constant dense<0.000000e+00> : vector<2x128xf32>
    %70 = tpu.matmul %69, %14, %cst_19 {dimension_numbers = #tpu.dot_dimension_numbers<[1], [0], [0], [1], [0, 0, 1, 1], [], []>} : vector<2x32xf32>, vector<32x128xf32>, vector<2x128xf32> -> vector<2x128xf32>
    %71 = arith.addf %9, %70 : vector<2x128xf32>
    %72 = arith.negf %71 : vector<2x128xf32>
    %73 = math.exp %72 : vector<2x128xf32>
    %cst_20 = arith.constant 1.000000e+00 : f32
    %74 = vector.broadcast %cst_20 : f32 to vector<2x128xf32>
    %75 = arith.addf %74, %73 : vector<2x128xf32>
    %76 = arith.divf %74, %75 : vector<2x128xf32>
    %77 = math.tanh %71 : vector<2x128xf32>
    %78 = vector.extract_strided_slice %76 {offsets = [0, 0], sizes = [2, 32], strides = [1, 1]} : vector<2x128xf32> to vector<2x32xf32>
    %79 = vector.extract_strided_slice %76 {offsets = [0, 32], sizes = [2, 32], strides = [1, 1]} : vector<2x128xf32> to vector<2x32xf32>
    %80 = vector.extract_strided_slice %77 {offsets = [0, 64], sizes = [2, 32], strides = [1, 1]} : vector<2x128xf32> to vector<2x32xf32>
    %81 = vector.extract_strided_slice %76 {offsets = [0, 96], sizes = [2, 32], strides = [1, 1]} : vector<2x128xf32> to vector<2x32xf32>
    %82 = arith.mulf %79, %67 : vector<2x32xf32>
    %83 = arith.mulf %78, %80 : vector<2x32xf32>
    %84 = arith.addf %82, %83 : vector<2x32xf32>
    %85 = math.tanh %84 : vector<2x32xf32>
    %86 = arith.mulf %81, %85 : vector<2x32xf32>
    %cst_21 = arith.constant dense<0.000000e+00> : vector<2x128xf32>
    %87 = tpu.matmul %86, %14, %cst_21 {dimension_numbers = #tpu.dot_dimension_numbers<[1], [0], [0], [1], [0, 0, 1, 1], [], []>} : vector<2x32xf32>, vector<32x128xf32>, vector<2x128xf32> -> vector<2x128xf32>
    %88 = arith.addf %10, %87 : vector<2x128xf32>
    %89 = arith.negf %88 : vector<2x128xf32>
    %90 = math.exp %89 : vector<2x128xf32>
    %cst_22 = arith.constant 1.000000e+00 : f32
    %91 = vector.broadcast %cst_22 : f32 to vector<2x128xf32>
    %92 = arith.addf %91, %90 : vector<2x128xf32>
    %93 = arith.divf %91, %92 : vector<2x128xf32>
    %94 = math.tanh %88 : vector<2x128xf32>
    %95 = vector.extract_strided_slice %93 {offsets = [0, 0], sizes = [2, 32], strides = [1, 1]} : vector<2x128xf32> to vector<2x32xf32>
    %96 = vector.extract_strided_slice %93 {offsets = [0, 32], sizes = [2, 32], strides = [1, 1]} : vector<2x128xf32> to vector<2x32xf32>
    %97 = vector.extract_strided_slice %94 {offsets = [0, 64], sizes = [2, 32], strides = [1, 1]} : vector<2x128xf32> to vector<2x32xf32>
    %98 = vector.extract_strided_slice %93 {offsets = [0, 96], sizes = [2, 32], strides = [1, 1]} : vector<2x128xf32> to vector<2x32xf32>
    %99 = arith.mulf %96, %84 : vector<2x32xf32>
    %100 = arith.mulf %95, %97 : vector<2x32xf32>
    %101 = arith.addf %99, %100 : vector<2x32xf32>
    %102 = math.tanh %101 : vector<2x32xf32>
    %103 = arith.mulf %98, %102 : vector<2x32xf32>
    %cst_23 = arith.constant dense<0.000000e+00> : vector<2x128xf32>
    %104 = tpu.matmul %103, %14, %cst_23 {dimension_numbers = #tpu.dot_dimension_numbers<[1], [0], [0], [1], [0, 0, 1, 1], [], []>} : vector<2x32xf32>, vector<32x128xf32>, vector<2x128xf32> -> vector<2x128xf32>
    %105 = arith.addf %11, %104 : vector<2x128xf32>
    %106 = arith.negf %105 : vector<2x128xf32>
    %107 = math.exp %106 : vector<2x128xf32>
    %cst_24 = arith.constant 1.000000e+00 : f32
    %108 = vector.broadcast %cst_24 : f32 to vector<2x128xf32>
    %109 = arith.addf %108, %107 : vector<2x128xf32>
    %110 = arith.divf %108, %109 : vector<2x128xf32>
    %111 = math.tanh %105 : vector<2x128xf32>
    %112 = vector.extract_strided_slice %110 {offsets = [0, 0], sizes = [2, 32], strides = [1, 1]} : vector<2x128xf32> to vector<2x32xf32>
    %113 = vector.extract_strided_slice %110 {offsets = [0, 32], sizes = [2, 32], strides = [1, 1]} : vector<2x128xf32> to vector<2x32xf32>
    %114 = vector.extract_strided_slice %111 {offsets = [0, 64], sizes = [2, 32], strides = [1, 1]} : vector<2x128xf32> to vector<2x32xf32>
    %115 = vector.extract_strided_slice %110 {offsets = [0, 96], sizes = [2, 32], strides = [1, 1]} : vector<2x128xf32> to vector<2x32xf32>
    %116 = arith.mulf %113, %101 : vector<2x32xf32>
    %117 = arith.mulf %112, %114 : vector<2x32xf32>
    %118 = arith.addf %116, %117 : vector<2x32xf32>
    %119 = math.tanh %118 : vector<2x32xf32>
    %120 = arith.mulf %115, %119 : vector<2x32xf32>
    %cst_25 = arith.constant dense<0.000000e+00> : vector<2x128xf32>
    %121 = tpu.matmul %120, %14, %cst_25 {dimension_numbers = #tpu.dot_dimension_numbers<[1], [0], [0], [1], [0, 0, 1, 1], [], []>} : vector<2x32xf32>, vector<32x128xf32>, vector<2x128xf32> -> vector<2x128xf32>
    %122 = arith.addf %12, %121 : vector<2x128xf32>
    %123 = arith.negf %122 : vector<2x128xf32>
    %124 = math.exp %123 : vector<2x128xf32>
    %cst_26 = arith.constant 1.000000e+00 : f32
    %125 = vector.broadcast %cst_26 : f32 to vector<2x128xf32>
    %126 = arith.addf %125, %124 : vector<2x128xf32>
    %127 = arith.divf %125, %126 : vector<2x128xf32>
    %128 = math.tanh %122 : vector<2x128xf32>
    %129 = vector.extract_strided_slice %127 {offsets = [0, 0], sizes = [2, 32], strides = [1, 1]} : vector<2x128xf32> to vector<2x32xf32>
    %130 = vector.extract_strided_slice %127 {offsets = [0, 32], sizes = [2, 32], strides = [1, 1]} : vector<2x128xf32> to vector<2x32xf32>
    %131 = vector.extract_strided_slice %128 {offsets = [0, 64], sizes = [2, 32], strides = [1, 1]} : vector<2x128xf32> to vector<2x32xf32>
    %132 = vector.extract_strided_slice %127 {offsets = [0, 96], sizes = [2, 32], strides = [1, 1]} : vector<2x128xf32> to vector<2x32xf32>
    %133 = arith.mulf %130, %118 : vector<2x32xf32>
    %134 = arith.mulf %129, %131 : vector<2x32xf32>
    %135 = arith.addf %133, %134 : vector<2x32xf32>
    %136 = math.tanh %135 : vector<2x32xf32>
    %137 = arith.mulf %132, %136 : vector<2x32xf32>
    %cst_27 = arith.constant dense<0.000000e+00> : vector<2x128xf32>
    %138 = tpu.matmul %137, %14, %cst_27 {dimension_numbers = #tpu.dot_dimension_numbers<[1], [0], [0], [1], [0, 0, 1, 1], [], []>} : vector<2x32xf32>, vector<32x128xf32>, vector<2x128xf32> -> vector<2x128xf32>
    %139 = arith.addf %13, %138 : vector<2x128xf32>
    %140 = arith.negf %139 : vector<2x128xf32>
    %141 = math.exp %140 : vector<2x128xf32>
    %cst_28 = arith.constant 1.000000e+00 : f32
    %142 = vector.broadcast %cst_28 : f32 to vector<2x128xf32>
    %143 = arith.addf %142, %141 : vector<2x128xf32>
    %144 = arith.divf %142, %143 : vector<2x128xf32>
    %145 = math.tanh %139 : vector<2x128xf32>
    %146 = vector.extract_strided_slice %144 {offsets = [0, 0], sizes = [2, 32], strides = [1, 1]} : vector<2x128xf32> to vector<2x32xf32>
    %147 = vector.extract_strided_slice %144 {offsets = [0, 32], sizes = [2, 32], strides = [1, 1]} : vector<2x128xf32> to vector<2x32xf32>
    %148 = vector.extract_strided_slice %145 {offsets = [0, 64], sizes = [2, 32], strides = [1, 1]} : vector<2x128xf32> to vector<2x32xf32>
    %149 = vector.extract_strided_slice %144 {offsets = [0, 96], sizes = [2, 32], strides = [1, 1]} : vector<2x128xf32> to vector<2x32xf32>
    %150 = arith.mulf %147, %135 : vector<2x32xf32>
    %151 = arith.mulf %146, %148 : vector<2x32xf32>
    %152 = arith.addf %150, %151 : vector<2x32xf32>
    %153 = math.tanh %152 : vector<2x32xf32>
    %154 = arith.mulf %149, %153 : vector<2x32xf32>
    %c0_29 = arith.constant 0 : index
    %c0_30 = arith.constant 0 : index
    %155 = vector.load %arg4[%c0_29, %c0_30] : memref<32x128xf32, #tpu.memory_space<vmem>>, vector<32x128xf32>
    %c0_31 = arith.constant 0 : index
    %c0_32 = arith.constant 0 : index
    %156 = vector.load %arg6[%c0_31, %c0_32] : memref<1x128xf32, #tpu.memory_space<vmem>>, vector<1x128xf32>
    %cst_33 = arith.constant dense<0.000000e+00> : vector<2x128xf32>
    %157 = tpu.matmul %35, %155, %cst_33 {dimension_numbers = #tpu.dot_dimension_numbers<[1], [0], [0], [1], [0, 0, 1, 1], [], []>} : vector<2x32xf32>, vector<32x128xf32>, vector<2x128xf32> -> vector<2x128xf32>
    %158 = vector.broadcast %156 : vector<1x128xf32> to vector<2x128xf32>
    %159 = arith.addf %157, %158 : vector<2x128xf32>
    %cst_34 = arith.constant dense<0.000000e+00> : vector<2x128xf32>
    %160 = tpu.matmul %52, %155, %cst_34 {dimension_numbers = #tpu.dot_dimension_numbers<[1], [0], [0], [1], [0, 0, 1, 1], [], []>} : vector<2x32xf32>, vector<32x128xf32>, vector<2x128xf32> -> vector<2x128xf32>
    %161 = vector.broadcast %156 : vector<1x128xf32> to vector<2x128xf32>
    %162 = arith.addf %160, %161 : vector<2x128xf32>
    %cst_35 = arith.constant dense<0.000000e+00> : vector<2x128xf32>
    %163 = tpu.matmul %69, %155, %cst_35 {dimension_numbers = #tpu.dot_dimension_numbers<[1], [0], [0], [1], [0, 0, 1, 1], [], []>} : vector<2x32xf32>, vector<32x128xf32>, vector<2x128xf32> -> vector<2x128xf32>
    %164 = vector.broadcast %156 : vector<1x128xf32> to vector<2x128xf32>
    %165 = arith.addf %163, %164 : vector<2x128xf32>
    %cst_36 = arith.constant dense<0.000000e+00> : vector<2x128xf32>
    %166 = tpu.matmul %86, %155, %cst_36 {dimension_numbers = #tpu.dot_dimension_numbers<[1], [0], [0], [1], [0, 0, 1, 1], [], []>} : vector<2x32xf32>, vector<32x128xf32>, vector<2x128xf32> -> vector<2x128xf32>
    %167 = vector.broadcast %156 : vector<1x128xf32> to vector<2x128xf32>
    %168 = arith.addf %166, %167 : vector<2x128xf32>
    %cst_37 = arith.constant dense<0.000000e+00> : vector<2x128xf32>
    %169 = tpu.matmul %103, %155, %cst_37 {dimension_numbers = #tpu.dot_dimension_numbers<[1], [0], [0], [1], [0, 0, 1, 1], [], []>} : vector<2x32xf32>, vector<32x128xf32>, vector<2x128xf32> -> vector<2x128xf32>
    %170 = vector.broadcast %156 : vector<1x128xf32> to vector<2x128xf32>
    %171 = arith.addf %169, %170 : vector<2x128xf32>
    %cst_38 = arith.constant dense<0.000000e+00> : vector<2x128xf32>
    %172 = tpu.matmul %120, %155, %cst_38 {dimension_numbers = #tpu.dot_dimension_numbers<[1], [0], [0], [1], [0, 0, 1, 1], [], []>} : vector<2x32xf32>, vector<32x128xf32>, vector<2x128xf32> -> vector<2x128xf32>
    %173 = vector.broadcast %156 : vector<1x128xf32> to vector<2x128xf32>
    %174 = arith.addf %172, %173 : vector<2x128xf32>
    %cst_39 = arith.constant dense<0.000000e+00> : vector<2x128xf32>
    %175 = tpu.matmul %137, %155, %cst_39 {dimension_numbers = #tpu.dot_dimension_numbers<[1], [0], [0], [1], [0, 0, 1, 1], [], []>} : vector<2x32xf32>, vector<32x128xf32>, vector<2x128xf32> -> vector<2x128xf32>
    %176 = vector.broadcast %156 : vector<1x128xf32> to vector<2x128xf32>
    %177 = arith.addf %175, %176 : vector<2x128xf32>
    %cst_40 = arith.constant dense<0.000000e+00> : vector<2x128xf32>
    %178 = tpu.matmul %154, %155, %cst_40 {dimension_numbers = #tpu.dot_dimension_numbers<[1], [0], [0], [1], [0, 0, 1, 1], [], []>} : vector<2x32xf32>, vector<32x128xf32>, vector<2x128xf32> -> vector<2x128xf32>
    %179 = vector.broadcast %156 : vector<1x128xf32> to vector<2x128xf32>
    %180 = arith.addf %178, %179 : vector<2x128xf32>
    %c0_41 = arith.constant 0 : index
    %c0_42 = arith.constant 0 : index
    %181 = vector.load %arg5[%c0_41, %c0_42] : memref<32x128xf32, #tpu.memory_space<vmem>>, vector<32x128xf32>
    %c1 = arith.constant 1 : index
    %c0_43 = arith.constant 0 : index
    %c0_44 = arith.constant 0 : index
    %182 = vector.load %arg12[%c1, %c0_43, %c0_44] : memref<3x2x32xf32, #tpu.memory_space<vmem>>, vector<1x2x32xf32>
    %183 = vector.shape_cast %182 : vector<1x2x32xf32> to vector<2x32xf32>
    %c1_45 = arith.constant 1 : index
    %c0_46 = arith.constant 0 : index
    %c0_47 = arith.constant 0 : index
    %184 = vector.load %arg13[%c1_45, %c0_46, %c0_47] : memref<3x2x32xf32, #tpu.memory_space<vmem>>, vector<1x2x32xf32>
    %185 = vector.shape_cast %184 : vector<1x2x32xf32> to vector<2x32xf32>
    %cst_48 = arith.constant dense<0.000000e+00> : vector<2x128xf32>
    %186 = tpu.matmul %183, %181, %cst_48 {dimension_numbers = #tpu.dot_dimension_numbers<[1], [0], [0], [1], [0, 0, 1, 1], [], []>} : vector<2x32xf32>, vector<32x128xf32>, vector<2x128xf32> -> vector<2x128xf32>
    %187 = arith.addf %159, %186 : vector<2x128xf32>
    %188 = arith.negf %187 : vector<2x128xf32>
    %189 = math.exp %188 : vector<2x128xf32>
    %cst_49 = arith.constant 1.000000e+00 : f32
    %190 = vector.broadcast %cst_49 : f32 to vector<2x128xf32>
    %191 = arith.addf %190, %189 : vector<2x128xf32>
    %192 = arith.divf %190, %191 : vector<2x128xf32>
    %193 = math.tanh %187 : vector<2x128xf32>
    %194 = vector.extract_strided_slice %192 {offsets = [0, 0], sizes = [2, 32], strides = [1, 1]} : vector<2x128xf32> to vector<2x32xf32>
    %195 = vector.extract_strided_slice %192 {offsets = [0, 32], sizes = [2, 32], strides = [1, 1]} : vector<2x128xf32> to vector<2x32xf32>
    %196 = vector.extract_strided_slice %193 {offsets = [0, 64], sizes = [2, 32], strides = [1, 1]} : vector<2x128xf32> to vector<2x32xf32>
    %197 = vector.extract_strided_slice %192 {offsets = [0, 96], sizes = [2, 32], strides = [1, 1]} : vector<2x128xf32> to vector<2x32xf32>
    %198 = arith.mulf %195, %185 : vector<2x32xf32>
    %199 = arith.mulf %194, %196 : vector<2x32xf32>
    %200 = arith.addf %198, %199 : vector<2x32xf32>
    %201 = math.tanh %200 : vector<2x32xf32>
    %202 = arith.mulf %197, %201 : vector<2x32xf32>
    %cst_50 = arith.constant dense<0.000000e+00> : vector<2x128xf32>
    %203 = tpu.matmul %202, %181, %cst_50 {dimension_numbers = #tpu.dot_dimension_numbers<[1], [0], [0], [1], [0, 0, 1, 1], [], []>} : vector<2x32xf32>, vector<32x128xf32>, vector<2x128xf32> -> vector<2x128xf32>
    %204 = arith.addf %162, %203 : vector<2x128xf32>
    %205 = arith.negf %204 : vector<2x128xf32>
    %206 = math.exp %205 : vector<2x128xf32>
    %cst_51 = arith.constant 1.000000e+00 : f32
    %207 = vector.broadcast %cst_51 : f32 to vector<2x128xf32>
    %208 = arith.addf %207, %206 : vector<2x128xf32>
    %209 = arith.divf %207, %208 : vector<2x128xf32>
    %210 = math.tanh %204 : vector<2x128xf32>
    %211 = vector.extract_strided_slice %209 {offsets = [0, 0], sizes = [2, 32], strides = [1, 1]} : vector<2x128xf32> to vector<2x32xf32>
    %212 = vector.extract_strided_slice %209 {offsets = [0, 32], sizes = [2, 32], strides = [1, 1]} : vector<2x128xf32> to vector<2x32xf32>
    %213 = vector.extract_strided_slice %210 {offsets = [0, 64], sizes = [2, 32], strides = [1, 1]} : vector<2x128xf32> to vector<2x32xf32>
    %214 = vector.extract_strided_slice %209 {offsets = [0, 96], sizes = [2, 32], strides = [1, 1]} : vector<2x128xf32> to vector<2x32xf32>
    %215 = arith.mulf %212, %200 : vector<2x32xf32>
    %216 = arith.mulf %211, %213 : vector<2x32xf32>
    %217 = arith.addf %215, %216 : vector<2x32xf32>
    %218 = math.tanh %217 : vector<2x32xf32>
    %219 = arith.mulf %214, %218 : vector<2x32xf32>
    %cst_52 = arith.constant dense<0.000000e+00> : vector<2x128xf32>
    %220 = tpu.matmul %219, %181, %cst_52 {dimension_numbers = #tpu.dot_dimension_numbers<[1], [0], [0], [1], [0, 0, 1, 1], [], []>} : vector<2x32xf32>, vector<32x128xf32>, vector<2x128xf32> -> vector<2x128xf32>
    %221 = arith.addf %165, %220 : vector<2x128xf32>
    %222 = arith.negf %221 : vector<2x128xf32>
    %223 = math.exp %222 : vector<2x128xf32>
    %cst_53 = arith.constant 1.000000e+00 : f32
    %224 = vector.broadcast %cst_53 : f32 to vector<2x128xf32>
    %225 = arith.addf %224, %223 : vector<2x128xf32>
    %226 = arith.divf %224, %225 : vector<2x128xf32>
    %227 = math.tanh %221 : vector<2x128xf32>
    %228 = vector.extract_strided_slice %226 {offsets = [0, 0], sizes = [2, 32], strides = [1, 1]} : vector<2x128xf32> to vector<2x32xf32>
    %229 = vector.extract_strided_slice %226 {offsets = [0, 32], sizes = [2, 32], strides = [1, 1]} : vector<2x128xf32> to vector<2x32xf32>
    %230 = vector.extract_strided_slice %227 {offsets = [0, 64], sizes = [2, 32], strides = [1, 1]} : vector<2x128xf32> to vector<2x32xf32>
    %231 = vector.extract_strided_slice %226 {offsets = [0, 96], sizes = [2, 32], strides = [1, 1]} : vector<2x128xf32> to vector<2x32xf32>
    %232 = arith.mulf %229, %217 : vector<2x32xf32>
    %233 = arith.mulf %228, %230 : vector<2x32xf32>
    %234 = arith.addf %232, %233 : vector<2x32xf32>
    %235 = math.tanh %234 : vector<2x32xf32>
    %236 = arith.mulf %231, %235 : vector<2x32xf32>
    %cst_54 = arith.constant dense<0.000000e+00> : vector<2x128xf32>
    %237 = tpu.matmul %236, %181, %cst_54 {dimension_numbers = #tpu.dot_dimension_numbers<[1], [0], [0], [1], [0, 0, 1, 1], [], []>} : vector<2x32xf32>, vector<32x128xf32>, vector<2x128xf32> -> vector<2x128xf32>
    %238 = arith.addf %168, %237 : vector<2x128xf32>
    %239 = arith.negf %238 : vector<2x128xf32>
    %240 = math.exp %239 : vector<2x128xf32>
    %cst_55 = arith.constant 1.000000e+00 : f32
    %241 = vector.broadcast %cst_55 : f32 to vector<2x128xf32>
    %242 = arith.addf %241, %240 : vector<2x128xf32>
    %243 = arith.divf %241, %242 : vector<2x128xf32>
    %244 = math.tanh %238 : vector<2x128xf32>
    %245 = vector.extract_strided_slice %243 {offsets = [0, 0], sizes = [2, 32], strides = [1, 1]} : vector<2x128xf32> to vector<2x32xf32>
    %246 = vector.extract_strided_slice %243 {offsets = [0, 32], sizes = [2, 32], strides = [1, 1]} : vector<2x128xf32> to vector<2x32xf32>
    %247 = vector.extract_strided_slice %244 {offsets = [0, 64], sizes = [2, 32], strides = [1, 1]} : vector<2x128xf32> to vector<2x32xf32>
    %248 = vector.extract_strided_slice %243 {offsets = [0, 96], sizes = [2, 32], strides = [1, 1]} : vector<2x128xf32> to vector<2x32xf32>
    %249 = arith.mulf %246, %234 : vector<2x32xf32>
    %250 = arith.mulf %245, %247 : vector<2x32xf32>
    %251 = arith.addf %249, %250 : vector<2x32xf32>
    %252 = math.tanh %251 : vector<2x32xf32>
    %253 = arith.mulf %248, %252 : vector<2x32xf32>
    %cst_56 = arith.constant dense<0.000000e+00> : vector<2x128xf32>
    %254 = tpu.matmul %253, %181, %cst_56 {dimension_numbers = #tpu.dot_dimension_numbers<[1], [0], [0], [1], [0, 0, 1, 1], [], []>} : vector<2x32xf32>, vector<32x128xf32>, vector<2x128xf32> -> vector<2x128xf32>
    %255 = arith.addf %171, %254 : vector<2x128xf32>
    %256 = arith.negf %255 : vector<2x128xf32>
    %257 = math.exp %256 : vector<2x128xf32>
    %cst_57 = arith.constant 1.000000e+00 : f32
    %258 = vector.broadcast %cst_57 : f32 to vector<2x128xf32>
    %259 = arith.addf %258, %257 : vector<2x128xf32>
    %260 = arith.divf %258, %259 : vector<2x128xf32>
    %261 = math.tanh %255 : vector<2x128xf32>
    %262 = vector.extract_strided_slice %260 {offsets = [0, 0], sizes = [2, 32], strides = [1, 1]} : vector<2x128xf32> to vector<2x32xf32>
    %263 = vector.extract_strided_slice %260 {offsets = [0, 32], sizes = [2, 32], strides = [1, 1]} : vector<2x128xf32> to vector<2x32xf32>
    %264 = vector.extract_strided_slice %261 {offsets = [0, 64], sizes = [2, 32], strides = [1, 1]} : vector<2x128xf32> to vector<2x32xf32>
    %265 = vector.extract_strided_slice %260 {offsets = [0, 96], sizes = [2, 32], strides = [1, 1]} : vector<2x128xf32> to vector<2x32xf32>
    %266 = arith.mulf %263, %251 : vector<2x32xf32>
    %267 = arith.mulf %262, %264 : vector<2x32xf32>
    %268 = arith.addf %266, %267 : vector<2x32xf32>
    %269 = math.tanh %268 : vector<2x32xf32>
    %270 = arith.mulf %265, %269 : vector<2x32xf32>
    %cst_58 = arith.constant dense<0.000000e+00> : vector<2x128xf32>
    %271 = tpu.matmul %270, %181, %cst_58 {dimension_numbers = #tpu.dot_dimension_numbers<[1], [0], [0], [1], [0, 0, 1, 1], [], []>} : vector<2x32xf32>, vector<32x128xf32>, vector<2x128xf32> -> vector<2x128xf32>
    %272 = arith.addf %174, %271 : vector<2x128xf32>
    %273 = arith.negf %272 : vector<2x128xf32>
    %274 = math.exp %273 : vector<2x128xf32>
    %cst_59 = arith.constant 1.000000e+00 : f32
    %275 = vector.broadcast %cst_59 : f32 to vector<2x128xf32>
    %276 = arith.addf %275, %274 : vector<2x128xf32>
    %277 = arith.divf %275, %276 : vector<2x128xf32>
    %278 = math.tanh %272 : vector<2x128xf32>
    %279 = vector.extract_strided_slice %277 {offsets = [0, 0], sizes = [2, 32], strides = [1, 1]} : vector<2x128xf32> to vector<2x32xf32>
    %280 = vector.extract_strided_slice %277 {offsets = [0, 32], sizes = [2, 32], strides = [1, 1]} : vector<2x128xf32> to vector<2x32xf32>
    %281 = vector.extract_strided_slice %278 {offsets = [0, 64], sizes = [2, 32], strides = [1, 1]} : vector<2x128xf32> to vector<2x32xf32>
    %282 = vector.extract_strided_slice %277 {offsets = [0, 96], sizes = [2, 32], strides = [1, 1]} : vector<2x128xf32> to vector<2x32xf32>
    %283 = arith.mulf %280, %268 : vector<2x32xf32>
    %284 = arith.mulf %279, %281 : vector<2x32xf32>
    %285 = arith.addf %283, %284 : vector<2x32xf32>
    %286 = math.tanh %285 : vector<2x32xf32>
    %287 = arith.mulf %282, %286 : vector<2x32xf32>
    %cst_60 = arith.constant dense<0.000000e+00> : vector<2x128xf32>
    %288 = tpu.matmul %287, %181, %cst_60 {dimension_numbers = #tpu.dot_dimension_numbers<[1], [0], [0], [1], [0, 0, 1, 1], [], []>} : vector<2x32xf32>, vector<32x128xf32>, vector<2x128xf32> -> vector<2x128xf32>
    %289 = arith.addf %177, %288 : vector<2x128xf32>
    %290 = arith.negf %289 : vector<2x128xf32>
    %291 = math.exp %290 : vector<2x128xf32>
    %cst_61 = arith.constant 1.000000e+00 : f32
    %292 = vector.broadcast %cst_61 : f32 to vector<2x128xf32>
    %293 = arith.addf %292, %291 : vector<2x128xf32>
    %294 = arith.divf %292, %293 : vector<2x128xf32>
    %295 = math.tanh %289 : vector<2x128xf32>
    %296 = vector.extract_strided_slice %294 {offsets = [0, 0], sizes = [2, 32], strides = [1, 1]} : vector<2x128xf32> to vector<2x32xf32>
    %297 = vector.extract_strided_slice %294 {offsets = [0, 32], sizes = [2, 32], strides = [1, 1]} : vector<2x128xf32> to vector<2x32xf32>
    %298 = vector.extract_strided_slice %295 {offsets = [0, 64], sizes = [2, 32], strides = [1, 1]} : vector<2x128xf32> to vector<2x32xf32>
    %299 = vector.extract_strided_slice %294 {offsets = [0, 96], sizes = [2, 32], strides = [1, 1]} : vector<2x128xf32> to vector<2x32xf32>
    %300 = arith.mulf %297, %285 : vector<2x32xf32>
    %301 = arith.mulf %296, %298 : vector<2x32xf32>
    %302 = arith.addf %300, %301 : vector<2x32xf32>
    %303 = math.tanh %302 : vector<2x32xf32>
    %304 = arith.mulf %299, %303 : vector<2x32xf32>
    %cst_62 = arith.constant dense<0.000000e+00> : vector<2x128xf32>
    %305 = tpu.matmul %304, %181, %cst_62 {dimension_numbers = #tpu.dot_dimension_numbers<[1], [0], [0], [1], [0, 0, 1, 1], [], []>} : vector<2x32xf32>, vector<32x128xf32>, vector<2x128xf32> -> vector<2x128xf32>
    %306 = arith.addf %180, %305 : vector<2x128xf32>
    %307 = arith.negf %306 : vector<2x128xf32>
    %308 = math.exp %307 : vector<2x128xf32>
    %cst_63 = arith.constant 1.000000e+00 : f32
    %309 = vector.broadcast %cst_63 : f32 to vector<2x128xf32>
    %310 = arith.addf %309, %308 : vector<2x128xf32>
    %311 = arith.divf %309, %310 : vector<2x128xf32>
    %312 = math.tanh %306 : vector<2x128xf32>
    %313 = vector.extract_strided_slice %311 {offsets = [0, 0], sizes = [2, 32], strides = [1, 1]} : vector<2x128xf32> to vector<2x32xf32>
    %314 = vector.extract_strided_slice %311 {offsets = [0, 32], sizes = [2, 32], strides = [1, 1]} : vector<2x128xf32> to vector<2x32xf32>
    %315 = vector.extract_strided_slice %312 {offsets = [0, 64], sizes = [2, 32], strides = [1, 1]} : vector<2x128xf32> to vector<2x32xf32>
    %316 = vector.extract_strided_slice %311 {offsets = [0, 96], sizes = [2, 32], strides = [1, 1]} : vector<2x128xf32> to vector<2x32xf32>
    %317 = arith.mulf %314, %302 : vector<2x32xf32>
    %318 = arith.mulf %313, %315 : vector<2x32xf32>
    %319 = arith.addf %317, %318 : vector<2x32xf32>
    %320 = math.tanh %319 : vector<2x32xf32>
    %321 = arith.mulf %316, %320 : vector<2x32xf32>
    %c0_64 = arith.constant 0 : index
    %c0_65 = arith.constant 0 : index
    %322 = vector.load %arg7[%c0_64, %c0_65] : memref<32x128xf32, #tpu.memory_space<vmem>>, vector<32x128xf32>
    %c0_66 = arith.constant 0 : index
    %c0_67 = arith.constant 0 : index
    %323 = vector.load %arg9[%c0_66, %c0_67] : memref<1x128xf32, #tpu.memory_space<vmem>>, vector<1x128xf32>
    %cst_68 = arith.constant dense<0.000000e+00> : vector<2x128xf32>
    %324 = tpu.matmul %202, %322, %cst_68 {dimension_numbers = #tpu.dot_dimension_numbers<[1], [0], [0], [1], [0, 0, 1, 1], [], []>} : vector<2x32xf32>, vector<32x128xf32>, vector<2x128xf32> -> vector<2x128xf32>
    %325 = vector.broadcast %323 : vector<1x128xf32> to vector<2x128xf32>
    %326 = arith.addf %324, %325 : vector<2x128xf32>
    %cst_69 = arith.constant dense<0.000000e+00> : vector<2x128xf32>
    %327 = tpu.matmul %219, %322, %cst_69 {dimension_numbers = #tpu.dot_dimension_numbers<[1], [0], [0], [1], [0, 0, 1, 1], [], []>} : vector<2x32xf32>, vector<32x128xf32>, vector<2x128xf32> -> vector<2x128xf32>
    %328 = vector.broadcast %323 : vector<1x128xf32> to vector<2x128xf32>
    %329 = arith.addf %327, %328 : vector<2x128xf32>
    %cst_70 = arith.constant dense<0.000000e+00> : vector<2x128xf32>
    %330 = tpu.matmul %236, %322, %cst_70 {dimension_numbers = #tpu.dot_dimension_numbers<[1], [0], [0], [1], [0, 0, 1, 1], [], []>} : vector<2x32xf32>, vector<32x128xf32>, vector<2x128xf32> -> vector<2x128xf32>
    %331 = vector.broadcast %323 : vector<1x128xf32> to vector<2x128xf32>
    %332 = arith.addf %330, %331 : vector<2x128xf32>
    %cst_71 = arith.constant dense<0.000000e+00> : vector<2x128xf32>
    %333 = tpu.matmul %253, %322, %cst_71 {dimension_numbers = #tpu.dot_dimension_numbers<[1], [0], [0], [1], [0, 0, 1, 1], [], []>} : vector<2x32xf32>, vector<32x128xf32>, vector<2x128xf32> -> vector<2x128xf32>
    %334 = vector.broadcast %323 : vector<1x128xf32> to vector<2x128xf32>
    %335 = arith.addf %333, %334 : vector<2x128xf32>
    %cst_72 = arith.constant dense<0.000000e+00> : vector<2x128xf32>
    %336 = tpu.matmul %270, %322, %cst_72 {dimension_numbers = #tpu.dot_dimension_numbers<[1], [0], [0], [1], [0, 0, 1, 1], [], []>} : vector<2x32xf32>, vector<32x128xf32>, vector<2x128xf32> -> vector<2x128xf32>
    %337 = vector.broadcast %323 : vector<1x128xf32> to vector<2x128xf32>
    %338 = arith.addf %336, %337 : vector<2x128xf32>
    %cst_73 = arith.constant dense<0.000000e+00> : vector<2x128xf32>
    %339 = tpu.matmul %287, %322, %cst_73 {dimension_numbers = #tpu.dot_dimension_numbers<[1], [0], [0], [1], [0, 0, 1, 1], [], []>} : vector<2x32xf32>, vector<32x128xf32>, vector<2x128xf32> -> vector<2x128xf32>
    %340 = vector.broadcast %323 : vector<1x128xf32> to vector<2x128xf32>
    %341 = arith.addf %339, %340 : vector<2x128xf32>
    %cst_74 = arith.constant dense<0.000000e+00> : vector<2x128xf32>
    %342 = tpu.matmul %304, %322, %cst_74 {dimension_numbers = #tpu.dot_dimension_numbers<[1], [0], [0], [1], [0, 0, 1, 1], [], []>} : vector<2x32xf32>, vector<32x128xf32>, vector<2x128xf32> -> vector<2x128xf32>
    %343 = vector.broadcast %323 : vector<1x128xf32> to vector<2x128xf32>
    %344 = arith.addf %342, %343 : vector<2x128xf32>
    %cst_75 = arith.constant dense<0.000000e+00> : vector<2x128xf32>
    %345 = tpu.matmul %321, %322, %cst_75 {dimension_numbers = #tpu.dot_dimension_numbers<[1], [0], [0], [1], [0, 0, 1, 1], [], []>} : vector<2x32xf32>, vector<32x128xf32>, vector<2x128xf32> -> vector<2x128xf32>
    %346 = vector.broadcast %323 : vector<1x128xf32> to vector<2x128xf32>
    %347 = arith.addf %345, %346 : vector<2x128xf32>
    %c0_76 = arith.constant 0 : index
    %c0_77 = arith.constant 0 : index
    %348 = vector.load %arg8[%c0_76, %c0_77] : memref<32x128xf32, #tpu.memory_space<vmem>>, vector<32x128xf32>
    %c2 = arith.constant 2 : index
    %c0_78 = arith.constant 0 : index
    %c0_79 = arith.constant 0 : index
    %349 = vector.load %arg12[%c2, %c0_78, %c0_79] : memref<3x2x32xf32, #tpu.memory_space<vmem>>, vector<1x2x32xf32>
    %350 = vector.shape_cast %349 : vector<1x2x32xf32> to vector<2x32xf32>
    %c2_80 = arith.constant 2 : index
    %c0_81 = arith.constant 0 : index
    %c0_82 = arith.constant 0 : index
    %351 = vector.load %arg13[%c2_80, %c0_81, %c0_82] : memref<3x2x32xf32, #tpu.memory_space<vmem>>, vector<1x2x32xf32>
    %352 = vector.shape_cast %351 : vector<1x2x32xf32> to vector<2x32xf32>
    %cst_83 = arith.constant dense<0.000000e+00> : vector<2x128xf32>
    %353 = tpu.matmul %350, %348, %cst_83 {dimension_numbers = #tpu.dot_dimension_numbers<[1], [0], [0], [1], [0, 0, 1, 1], [], []>} : vector<2x32xf32>, vector<32x128xf32>, vector<2x128xf32> -> vector<2x128xf32>
    %354 = arith.addf %326, %353 : vector<2x128xf32>
    %355 = arith.negf %354 : vector<2x128xf32>
    %356 = math.exp %355 : vector<2x128xf32>
    %cst_84 = arith.constant 1.000000e+00 : f32
    %357 = vector.broadcast %cst_84 : f32 to vector<2x128xf32>
    %358 = arith.addf %357, %356 : vector<2x128xf32>
    %359 = arith.divf %357, %358 : vector<2x128xf32>
    %360 = math.tanh %354 : vector<2x128xf32>
    %361 = vector.extract_strided_slice %359 {offsets = [0, 0], sizes = [2, 32], strides = [1, 1]} : vector<2x128xf32> to vector<2x32xf32>
    %362 = vector.extract_strided_slice %359 {offsets = [0, 32], sizes = [2, 32], strides = [1, 1]} : vector<2x128xf32> to vector<2x32xf32>
    %363 = vector.extract_strided_slice %360 {offsets = [0, 64], sizes = [2, 32], strides = [1, 1]} : vector<2x128xf32> to vector<2x32xf32>
    %364 = vector.extract_strided_slice %359 {offsets = [0, 96], sizes = [2, 32], strides = [1, 1]} : vector<2x128xf32> to vector<2x32xf32>
    %365 = arith.mulf %362, %352 : vector<2x32xf32>
    %366 = arith.mulf %361, %363 : vector<2x32xf32>
    %367 = arith.addf %365, %366 : vector<2x32xf32>
    %368 = math.tanh %367 : vector<2x32xf32>
    %369 = arith.mulf %364, %368 : vector<2x32xf32>
    %cst_85 = arith.constant dense<0.000000e+00> : vector<2x128xf32>
    %370 = tpu.matmul %369, %348, %cst_85 {dimension_numbers = #tpu.dot_dimension_numbers<[1], [0], [0], [1], [0, 0, 1, 1], [], []>} : vector<2x32xf32>, vector<32x128xf32>, vector<2x128xf32> -> vector<2x128xf32>
    %371 = arith.addf %329, %370 : vector<2x128xf32>
    %372 = arith.negf %371 : vector<2x128xf32>
    %373 = math.exp %372 : vector<2x128xf32>
    %cst_86 = arith.constant 1.000000e+00 : f32
    %374 = vector.broadcast %cst_86 : f32 to vector<2x128xf32>
    %375 = arith.addf %374, %373 : vector<2x128xf32>
    %376 = arith.divf %374, %375 : vector<2x128xf32>
    %377 = math.tanh %371 : vector<2x128xf32>
    %378 = vector.extract_strided_slice %376 {offsets = [0, 0], sizes = [2, 32], strides = [1, 1]} : vector<2x128xf32> to vector<2x32xf32>
    %379 = vector.extract_strided_slice %376 {offsets = [0, 32], sizes = [2, 32], strides = [1, 1]} : vector<2x128xf32> to vector<2x32xf32>
    %380 = vector.extract_strided_slice %377 {offsets = [0, 64], sizes = [2, 32], strides = [1, 1]} : vector<2x128xf32> to vector<2x32xf32>
    %381 = vector.extract_strided_slice %376 {offsets = [0, 96], sizes = [2, 32], strides = [1, 1]} : vector<2x128xf32> to vector<2x32xf32>
    %382 = arith.mulf %379, %367 : vector<2x32xf32>
    %383 = arith.mulf %378, %380 : vector<2x32xf32>
    %384 = arith.addf %382, %383 : vector<2x32xf32>
    %385 = math.tanh %384 : vector<2x32xf32>
    %386 = arith.mulf %381, %385 : vector<2x32xf32>
    %cst_87 = arith.constant dense<0.000000e+00> : vector<2x128xf32>
    %387 = tpu.matmul %386, %348, %cst_87 {dimension_numbers = #tpu.dot_dimension_numbers<[1], [0], [0], [1], [0, 0, 1, 1], [], []>} : vector<2x32xf32>, vector<32x128xf32>, vector<2x128xf32> -> vector<2x128xf32>
    %388 = arith.addf %332, %387 : vector<2x128xf32>
    %389 = arith.negf %388 : vector<2x128xf32>
    %390 = math.exp %389 : vector<2x128xf32>
    %cst_88 = arith.constant 1.000000e+00 : f32
    %391 = vector.broadcast %cst_88 : f32 to vector<2x128xf32>
    %392 = arith.addf %391, %390 : vector<2x128xf32>
    %393 = arith.divf %391, %392 : vector<2x128xf32>
    %394 = math.tanh %388 : vector<2x128xf32>
    %395 = vector.extract_strided_slice %393 {offsets = [0, 0], sizes = [2, 32], strides = [1, 1]} : vector<2x128xf32> to vector<2x32xf32>
    %396 = vector.extract_strided_slice %393 {offsets = [0, 32], sizes = [2, 32], strides = [1, 1]} : vector<2x128xf32> to vector<2x32xf32>
    %397 = vector.extract_strided_slice %394 {offsets = [0, 64], sizes = [2, 32], strides = [1, 1]} : vector<2x128xf32> to vector<2x32xf32>
    %398 = vector.extract_strided_slice %393 {offsets = [0, 96], sizes = [2, 32], strides = [1, 1]} : vector<2x128xf32> to vector<2x32xf32>
    %399 = arith.mulf %396, %384 : vector<2x32xf32>
    %400 = arith.mulf %395, %397 : vector<2x32xf32>
    %401 = arith.addf %399, %400 : vector<2x32xf32>
    %402 = math.tanh %401 : vector<2x32xf32>
    %403 = arith.mulf %398, %402 : vector<2x32xf32>
    %cst_89 = arith.constant dense<0.000000e+00> : vector<2x128xf32>
    %404 = tpu.matmul %403, %348, %cst_89 {dimension_numbers = #tpu.dot_dimension_numbers<[1], [0], [0], [1], [0, 0, 1, 1], [], []>} : vector<2x32xf32>, vector<32x128xf32>, vector<2x128xf32> -> vector<2x128xf32>
    %405 = arith.addf %335, %404 : vector<2x128xf32>
    %406 = arith.negf %405 : vector<2x128xf32>
    %407 = math.exp %406 : vector<2x128xf32>
    %cst_90 = arith.constant 1.000000e+00 : f32
    %408 = vector.broadcast %cst_90 : f32 to vector<2x128xf32>
    %409 = arith.addf %408, %407 : vector<2x128xf32>
    %410 = arith.divf %408, %409 : vector<2x128xf32>
    %411 = math.tanh %405 : vector<2x128xf32>
    %412 = vector.extract_strided_slice %410 {offsets = [0, 0], sizes = [2, 32], strides = [1, 1]} : vector<2x128xf32> to vector<2x32xf32>
    %413 = vector.extract_strided_slice %410 {offsets = [0, 32], sizes = [2, 32], strides = [1, 1]} : vector<2x128xf32> to vector<2x32xf32>
    %414 = vector.extract_strided_slice %411 {offsets = [0, 64], sizes = [2, 32], strides = [1, 1]} : vector<2x128xf32> to vector<2x32xf32>
    %415 = vector.extract_strided_slice %410 {offsets = [0, 96], sizes = [2, 32], strides = [1, 1]} : vector<2x128xf32> to vector<2x32xf32>
    %416 = arith.mulf %413, %401 : vector<2x32xf32>
    %417 = arith.mulf %412, %414 : vector<2x32xf32>
    %418 = arith.addf %416, %417 : vector<2x32xf32>
    %419 = math.tanh %418 : vector<2x32xf32>
    %420 = arith.mulf %415, %419 : vector<2x32xf32>
    %cst_91 = arith.constant dense<0.000000e+00> : vector<2x128xf32>
    %421 = tpu.matmul %420, %348, %cst_91 {dimension_numbers = #tpu.dot_dimension_numbers<[1], [0], [0], [1], [0, 0, 1, 1], [], []>} : vector<2x32xf32>, vector<32x128xf32>, vector<2x128xf32> -> vector<2x128xf32>
    %422 = arith.addf %338, %421 : vector<2x128xf32>
    %423 = arith.negf %422 : vector<2x128xf32>
    %424 = math.exp %423 : vector<2x128xf32>
    %cst_92 = arith.constant 1.000000e+00 : f32
    %425 = vector.broadcast %cst_92 : f32 to vector<2x128xf32>
    %426 = arith.addf %425, %424 : vector<2x128xf32>
    %427 = arith.divf %425, %426 : vector<2x128xf32>
    %428 = math.tanh %422 : vector<2x128xf32>
    %429 = vector.extract_strided_slice %427 {offsets = [0, 0], sizes = [2, 32], strides = [1, 1]} : vector<2x128xf32> to vector<2x32xf32>
    %430 = vector.extract_strided_slice %427 {offsets = [0, 32], sizes = [2, 32], strides = [1, 1]} : vector<2x128xf32> to vector<2x32xf32>
    %431 = vector.extract_strided_slice %428 {offsets = [0, 64], sizes = [2, 32], strides = [1, 1]} : vector<2x128xf32> to vector<2x32xf32>
    %432 = vector.extract_strided_slice %427 {offsets = [0, 96], sizes = [2, 32], strides = [1, 1]} : vector<2x128xf32> to vector<2x32xf32>
    %433 = arith.mulf %430, %418 : vector<2x32xf32>
    %434 = arith.mulf %429, %431 : vector<2x32xf32>
    %435 = arith.addf %433, %434 : vector<2x32xf32>
    %436 = math.tanh %435 : vector<2x32xf32>
    %437 = arith.mulf %432, %436 : vector<2x32xf32>
    %cst_93 = arith.constant dense<0.000000e+00> : vector<2x128xf32>
    %438 = tpu.matmul %437, %348, %cst_93 {dimension_numbers = #tpu.dot_dimension_numbers<[1], [0], [0], [1], [0, 0, 1, 1], [], []>} : vector<2x32xf32>, vector<32x128xf32>, vector<2x128xf32> -> vector<2x128xf32>
    %439 = arith.addf %341, %438 : vector<2x128xf32>
    %440 = arith.negf %439 : vector<2x128xf32>
    %441 = math.exp %440 : vector<2x128xf32>
    %cst_94 = arith.constant 1.000000e+00 : f32
    %442 = vector.broadcast %cst_94 : f32 to vector<2x128xf32>
    %443 = arith.addf %442, %441 : vector<2x128xf32>
    %444 = arith.divf %442, %443 : vector<2x128xf32>
    %445 = math.tanh %439 : vector<2x128xf32>
    %446 = vector.extract_strided_slice %444 {offsets = [0, 0], sizes = [2, 32], strides = [1, 1]} : vector<2x128xf32> to vector<2x32xf32>
    %447 = vector.extract_strided_slice %444 {offsets = [0, 32], sizes = [2, 32], strides = [1, 1]} : vector<2x128xf32> to vector<2x32xf32>
    %448 = vector.extract_strided_slice %445 {offsets = [0, 64], sizes = [2, 32], strides = [1, 1]} : vector<2x128xf32> to vector<2x32xf32>
    %449 = vector.extract_strided_slice %444 {offsets = [0, 96], sizes = [2, 32], strides = [1, 1]} : vector<2x128xf32> to vector<2x32xf32>
    %450 = arith.mulf %447, %435 : vector<2x32xf32>
    %451 = arith.mulf %446, %448 : vector<2x32xf32>
    %452 = arith.addf %450, %451 : vector<2x32xf32>
    %453 = math.tanh %452 : vector<2x32xf32>
    %454 = arith.mulf %449, %453 : vector<2x32xf32>
    %cst_95 = arith.constant dense<0.000000e+00> : vector<2x128xf32>
    %455 = tpu.matmul %454, %348, %cst_95 {dimension_numbers = #tpu.dot_dimension_numbers<[1], [0], [0], [1], [0, 0, 1, 1], [], []>} : vector<2x32xf32>, vector<32x128xf32>, vector<2x128xf32> -> vector<2x128xf32>
    %456 = arith.addf %344, %455 : vector<2x128xf32>
    %457 = arith.negf %456 : vector<2x128xf32>
    %458 = math.exp %457 : vector<2x128xf32>
    %cst_96 = arith.constant 1.000000e+00 : f32
    %459 = vector.broadcast %cst_96 : f32 to vector<2x128xf32>
    %460 = arith.addf %459, %458 : vector<2x128xf32>
    %461 = arith.divf %459, %460 : vector<2x128xf32>
    %462 = math.tanh %456 : vector<2x128xf32>
    %463 = vector.extract_strided_slice %461 {offsets = [0, 0], sizes = [2, 32], strides = [1, 1]} : vector<2x128xf32> to vector<2x32xf32>
    %464 = vector.extract_strided_slice %461 {offsets = [0, 32], sizes = [2, 32], strides = [1, 1]} : vector<2x128xf32> to vector<2x32xf32>
    %465 = vector.extract_strided_slice %462 {offsets = [0, 64], sizes = [2, 32], strides = [1, 1]} : vector<2x128xf32> to vector<2x32xf32>
    %466 = vector.extract_strided_slice %461 {offsets = [0, 96], sizes = [2, 32], strides = [1, 1]} : vector<2x128xf32> to vector<2x32xf32>
    %467 = arith.mulf %464, %452 : vector<2x32xf32>
    %468 = arith.mulf %463, %465 : vector<2x32xf32>
    %469 = arith.addf %467, %468 : vector<2x32xf32>
    %470 = math.tanh %469 : vector<2x32xf32>
    %471 = arith.mulf %466, %470 : vector<2x32xf32>
    %cst_97 = arith.constant dense<0.000000e+00> : vector<2x128xf32>
    %472 = tpu.matmul %471, %348, %cst_97 {dimension_numbers = #tpu.dot_dimension_numbers<[1], [0], [0], [1], [0, 0, 1, 1], [], []>} : vector<2x32xf32>, vector<32x128xf32>, vector<2x128xf32> -> vector<2x128xf32>
    %473 = arith.addf %347, %472 : vector<2x128xf32>
    %474 = arith.negf %473 : vector<2x128xf32>
    %475 = math.exp %474 : vector<2x128xf32>
    %cst_98 = arith.constant 1.000000e+00 : f32
    %476 = vector.broadcast %cst_98 : f32 to vector<2x128xf32>
    %477 = arith.addf %476, %475 : vector<2x128xf32>
    %478 = arith.divf %476, %477 : vector<2x128xf32>
    %479 = math.tanh %473 : vector<2x128xf32>
    %480 = vector.extract_strided_slice %478 {offsets = [0, 0], sizes = [2, 32], strides = [1, 1]} : vector<2x128xf32> to vector<2x32xf32>
    %481 = vector.extract_strided_slice %478 {offsets = [0, 32], sizes = [2, 32], strides = [1, 1]} : vector<2x128xf32> to vector<2x32xf32>
    %482 = vector.extract_strided_slice %479 {offsets = [0, 64], sizes = [2, 32], strides = [1, 1]} : vector<2x128xf32> to vector<2x32xf32>
    %483 = vector.extract_strided_slice %478 {offsets = [0, 96], sizes = [2, 32], strides = [1, 1]} : vector<2x128xf32> to vector<2x32xf32>
    %484 = arith.mulf %481, %469 : vector<2x32xf32>
    %485 = arith.mulf %480, %482 : vector<2x32xf32>
    %486 = arith.addf %484, %485 : vector<2x32xf32>
    %487 = math.tanh %486 : vector<2x32xf32>
    %488 = arith.mulf %483, %487 : vector<2x32xf32>
    %489 = arith.addf %369, %386 : vector<2x32xf32>
    %490 = arith.addf %489, %403 : vector<2x32xf32>
    %491 = arith.addf %490, %420 : vector<2x32xf32>
    %492 = arith.addf %491, %437 : vector<2x32xf32>
    %493 = arith.addf %492, %454 : vector<2x32xf32>
    %494 = arith.addf %493, %471 : vector<2x32xf32>
    %495 = arith.addf %494, %488 : vector<2x32xf32>
    %c0_99 = arith.constant 0 : index
    %c0_100 = arith.constant 0 : index
    %496 = vector.load %arg10[%c0_99, %c0_100] : memref<32x60xf32, #tpu.memory_space<vmem>>, vector<32x60xf32>
    %cst_101 = arith.constant dense<0.000000e+00> : vector<2x60xf32>
    %497 = tpu.matmul %495, %496, %cst_101 {dimension_numbers = #tpu.dot_dimension_numbers<[1], [0], [0], [1], [0, 0, 1, 1], [], []>} : vector<2x32xf32>, vector<32x60xf32>, vector<2x60xf32> -> vector<2x60xf32>
    %c0_102 = arith.constant 0 : index
    %c0_103 = arith.constant 0 : index
    %498 = vector.load %arg11[%c0_102, %c0_103] : memref<1x60xf32, #tpu.memory_space<vmem>>, vector<1x60xf32>
    %499 = vector.broadcast %498 : vector<1x60xf32> to vector<2x60xf32>
    %500 = arith.addf %497, %499 : vector<2x60xf32>
    %501 = math.tanh %500 : vector<2x60xf32>
    %c0_104 = arith.constant 0 : index
    %c0_105 = arith.constant 0 : index
    %502 = vector.load %arg14[%c0_104, %c0_105] : memref<2x60xf32, #tpu.memory_space<vmem>>, vector<2x60xf32>
    tpu.vector_store %arg14[%c0_104, %c0_105], %501 {strides = array<i32>} : memref<2x60xf32, #tpu.memory_space<vmem>>, vector<2x60xf32>,
    return
  }
}

</mosaic_0001>

<bundles_post_ra>
// kernel: lstm_net_forward.1
= control target key start
LH: loop header
LB: loop body
LE: loop exit
PB: predicated region body
PF: predicated region fallthrough
CT: control target
= control target key end

     0   :  { %19 = vsyncpa [#allocation3], 0  ;;  %s6311_s0 = inlined_call_operand.hbm [shape: f32[16,16], index: 0, kind: input, shape index: {}]   ;;  %s6312_s1 = inlined_call_operand.hbm [shape: f32[16,128], index: 1, kind: input, shape index: {}]   ;;  %s6313_s2 = inlined_call_operand.hbm [shape: f32[32,128], index: 2, kind: input, shape index: {}]   ;;  %s6314_s3 = inlined_call_operand.vmem [shape: f32[1,128], index: 3, kind: input, shape index: {}]   ;;  %s6315_s4 = inlined_call_operand.hbm [shape: f32[32,128], index: 4, kind: input, shape index: {}]   ;;  %s6316_s5 = inlined_call_operand.hbm [shape: f32[32,128], index: 5, kind: input, shape index: {}]   ;;  %s6317_s6 = inlined_call_operand.hbm [shape: f32[1,128], index: 6, kind: input, shape index: {}]   ;;  %s6318_s7 = inlined_call_operand.vmem [shape: f32[32,128], index: 7, kind: input, shape index: {}]   ;;  %s6319_s8 = inlined_call_operand.hbm [shape: f32[32,128], index: 8, kind: input, shape index: {}]   ;;  %s6320_s9 = inlined_call_operand.hbm [shape: f32[1,128], index: 9, kind: input, shape index: {}]   ;;  %s6321_s10 = inlined_call_operand.hbm [shape: f32[32,60], index: 10, kind: input, shape index: {}]   ;;  %s6322_s11 = inlined_call_operand.hbm [shape: f32[1,60], index: 11, kind: input, shape index: {}]   ;;  %s6323_s12 = inlined_call_operand.vmem [shape: f32[3,2,32], index: 12, kind: input, shape index: {}]   ;;  %s6324_s13 = inlined_call_operand.vmem [shape: f32[3,2,32], index: 13, kind: input, shape index: {}]   ;;  %s6325_s14 = inlined_call_operand.hbm [shape: f32[2,60], index: 14, kind: output, shape index: {}]  }
   0x1   :  { %20 = vsyncpa [#allocation6], 0 }
   0x2   :  { %21 = vsyncpa [#allocation9], 0 }
   0x3   :  { %22 = vsyncpa [#allocation12], 0 }
   0x4   :  { %23 = vsyncpa [#allocation15], 0 }
   0x5   :  { %24 = vsyncpa [#allocation18], 0 }
   0x6   :  { %25 = vsyncpa [#allocation4], 0  ;;  %s5521_s29 = smov [#allocation5]   ;;  %s5522_s15 = smov [#allocation8]  }
   0x7   :  { %s43_s30 = sshll.u32 %s5521_s29, 4  ;;  %s69_s16 = sshll.u32 %s5522_s15, 4  ;;  %s44_s30 = int_to_ptr.vmem [resolvable:$true] %s43_s30  ;;  %s5614_s16 = int_to_ptr.vmem [resolvable:$true] %s69_s16 }
   0x8   :  { %s5265_s19 = scalar_lea.hbm %s6312_s1, 256 }
   0x9   :  { %p5266_p0 = scmp.ne.s32.totalorder %s6312_s1, %s5265_s19  ;;  %p5269_p1 = scmp.lt.u32.totalorder %s5265_s19, %s6312_s1 }
   0xb   :  { %p5271_p2 = pnand %p5269_p1, %p5266_p0 }
   0xd   :  { %5274 = shalt.err (!%p5271_p2)
}
   0xe   :  { %s5275_s24 = scalar_lea.vmem %s44_s30, 256  ;;  %p5280_p4 = scmp.lt.s32.totalorder %s44_s30, %s44_s30 }
   0xf   :  { %p5276_p3 = scmp.ne.s32.totalorder %s44_s30, %s5275_s24  ;;  %p5281_p5 = scmp.lt.s32.totalorder %s5275_s24, %s5275_s24 }
  0x11   :  { %p5282_p6 = por %p5281_p5, %p5280_p4 }
  0x13   :  { %p5283_p7 = pnand %p5282_p6, %p5276_p3 }
  0x15   :  { %5286 = shalt.err (!%p5283_p7)
}
  0x16   :  { %s5523_s25 = smov 128   ;;  %s5524_s26 = smov 8  }
  0x17   :  { %49 = dma.hbm_to_vmem [thread:$0]  %s6312_s1, 256, %s44_s30, [#allocation6], %s5523_s25, %s5523_s25, %s5524_s26  }
  0x18   :  { %s5287_s17 = scalar_lea.hbm %s6315_s4, 512 }
  0x19   :  { %p5288_p8 = scmp.ne.s32.totalorder %s6315_s4, %s5287_s17  ;;  %p5291_p9 = scmp.lt.u32.totalorder %s5287_s17, %s6315_s4 }
  0x1b   :  { %p5293_p10 = pnand %p5291_p9, %p5288_p8 }
  0x1d   :  { %5296 = shalt.err (!%p5293_p10)
}
  0x1e   :  { %s5297_s22 = scalar_lea.vmem %s5614_s16, 512  ;;  %p5302_p12 = scmp.lt.s32.totalorder %s5614_s16, %s5614_s16 }
  0x1f   :  { %p5298_p11 = scmp.ne.s32.totalorder %s5614_s16, %s5297_s22  ;;  %p5303_p13 = scmp.lt.s32.totalorder %s5297_s22, %s5297_s22 }
  0x21   :  { %p5304_p0 = por %p5303_p13, %p5302_p12 }
  0x23   :  { %p5305_p1 = pnand %p5304_p0, %p5298_p11 }
  0x25   :  { %5308 = shalt.err (!%p5305_p1)
}
  0x26   :  { %75 = dma.hbm_to_vmem [thread:$0]  %s6315_s4, 512, %s5614_s16, [#allocation9], %s5523_s25, %s5523_s25, %s5524_s26  }
  0x27   :  { %s5525_s23 = smov [#allocation11]   ;;  %s5526_s27 = smov [#allocation14]  }
  0x28   :  { %s94_s24 = sshll.u32 %s5525_s23, 4  ;;  %s118_s28 = sshll.u32 %s5526_s27, 4  ;;  %s95_s24 = int_to_ptr.vmem [resolvable:$true] %s94_s24  ;;  %s119_s28 = int_to_ptr.vmem [resolvable:$true] %s118_s28 }
  0x29   :  { %s5309_s17 = scalar_lea.hbm %s6317_s6, 16 }
  0x2a   :  { %p5310_p2 = scmp.ne.s32.totalorder %s6317_s6, %s5309_s17  ;;  %p5313_p3 = scmp.lt.u32.totalorder %s5309_s17, %s6317_s6 }
  0x2c   :  { %p5315_p4 = pnand %p5313_p3, %p5310_p2 }
  0x2e   :  { %5318 = shalt.err (!%p5315_p4)
}
  0x2f   :  { %s5319_s4 = scalar_lea.vmem %s95_s24, 16  ;;  %s5323_s16 = scalar_lea.vmem %s95_s24, 32 }
  0x30   :  { %p5320_p5 = scmp.ne.s32.totalorder %s95_s24, %s5319_s4  ;;  %p5324_p6 = scmp.lt.s32.totalorder %s95_s24, %s95_s24 }
  0x31   :  { %p5325_p7 = scmp.lt.s32.totalorder %s5323_s16, %s5319_s4 }
  0x33   :  { %p5326_p8 = por %p5325_p7, %p5324_p6 }
  0x35   :  { %p5327_p9 = pnand %p5326_p8, %p5320_p5 }
  0x37   :  { %5330 = shalt.err (!%p5327_p9)
}
  0x38   :  { %97 = dma.hbm_to_vmem [thread:$0]  %s6317_s6, 16, %s95_s24, [#allocation12]  }
  0x39   :  { %s5331_s27 = scalar_lea.hbm %s6320_s9, 16 }
  0x3a   :  { %p5332_p10 = scmp.ne.s32.totalorder %s6320_s9, %s5331_s27  ;;  %p5335_p11 = scmp.lt.u32.totalorder %s5331_s27, %s6320_s9 }
  0x3c   :  { %p5337_p12 = pnand %p5335_p11, %p5332_p10 }
  0x3e   :  { %5340 = shalt.err (!%p5337_p12)
}
  0x3f   :  { %s5341_s19 = scalar_lea.vmem %s119_s28, 16  ;;  %s5345_s20 = scalar_lea.vmem %s119_s28, 32 }
  0x40   :  { %p5342_p13 = scmp.ne.s32.totalorder %s119_s28, %s5341_s19  ;;  %p5346_p0 = scmp.lt.s32.totalorder %s119_s28, %s119_s28 }
  0x41   :  { %p5347_p1 = scmp.lt.s32.totalorder %s5345_s20, %s5341_s19 }
  0x43   :  { %p5348_p2 = por %p5347_p1, %p5346_p0 }
  0x45   :  { %p5349_p3 = pnand %p5348_p2, %p5342_p13 }
  0x47   :  { %5352 = shalt.err (!%p5349_p3)
}
  0x48   :  { %121 = dma.hbm_to_vmem [thread:$0]  %s6320_s9, 16, %s119_s28, [#allocation15]  }
  0x49   :  { %s5527_s21 = smov [#allocation2]   ;;  %s5528_s16 = smov [#allocation7]  }
  0x4a   :  { %s31_s4 = sshll.u32 %s5527_s21, 4  ;;  %s55_s22 = sshll.u32 %s5528_s16, 4  ;;  %s32_s4 = int_to_ptr.vmem [resolvable:$true] %s31_s4  ;;  %s5675_s22 = int_to_ptr.vmem [resolvable:$true] %s55_s22 }
  0x4b   :  { %s5353_s23 = scalar_lea.hbm %s6311_s0, 256 }
  0x4c   :  { %p5354_p4 = scmp.ne.s32.totalorder %s6311_s0, %s5353_s23  ;;  %p5357_p5 = scmp.lt.u32.totalorder %s5353_s23, %s6311_s0 }
  0x4e   :  { %p5359_p6 = pnand %p5357_p5, %p5354_p4 }
  0x50   :  { %5362 = shalt.err (!%p5359_p6)
}
  0x51   :  { %s5363_s9 = scalar_lea.vmem %s32_s4, 256  ;;  %p5368_p8 = scmp.lt.s32.totalorder %s32_s4, %s32_s4 }
  0x52   :  { %p5364_p7 = scmp.ne.s32.totalorder %s32_s4, %s5363_s9  ;;  %p5369_p9 = scmp.lt.s32.totalorder %s5363_s9, %s5363_s9 }
  0x54   :  { %p5370_p10 = por %p5369_p9, %p5368_p8 }
  0x56   :  { %p5371_p11 = pnand %p5370_p10, %p5364_p7 }
  0x58   :  { %5374 = shalt.err (!%p5371_p11)
}
  0x59   :  { %37 = dma.hbm_to_vmem [thread:$0]  %s6311_s0, 256, %s32_s4, [#allocation3], %s5523_s25, %s5523_s25, %s5524_s26  }
  0x5a   :  { %s5375_s6 = scalar_lea.hbm %s6313_s2, 512 }
  0x5b   :  { %p5376_p12 = scmp.ne.s32.totalorder %s6313_s2, %s5375_s6  ;;  %p5379_p13 = scmp.lt.u32.totalorder %s5375_s6, %s6313_s2 }
  0x5d   :  { %p5381_p0 = pnand %p5379_p13, %p5376_p12 }
  0x5f   :  { %5384 = shalt.err (!%p5381_p0)
}
  0x60   :  { %s5385_s30 = scalar_lea.vmem %s5675_s22, 512  ;;  %p5390_p2 = scmp.lt.s32.totalorder %s5675_s22, %s5675_s22 }
  0x61   :  { %p5386_p1 = scmp.ne.s32.totalorder %s5675_s22, %s5385_s30  ;;  %p5391_p3 = scmp.lt.s32.totalorder %s5385_s30, %s5385_s30 }
  0x63   :  { %p5392_p4 = por %p5391_p3, %p5390_p2 }
  0x65   :  { %p5393_p5 = pnand %p5392_p4, %p5386_p1 }
  0x67   :  { %5396 = shalt.err (!%p5393_p5)
}
  0x68   :  { %61 = dma.hbm_to_vmem [thread:$0]  %s6313_s2, 512, %s5675_s22, [#allocation6], %s5523_s25, %s5523_s25, %s5524_s26  }
  0x69   :  { %s5529_s23 = smov [#allocation10]   ;;  %s5530_s29 = smov [#allocation13]  }
  0x6a   :  { %s81_s27 = sshll.u32 %s5529_s23, 4  ;;  %s105_s15 = sshll.u32 %s5530_s29, 4  ;;  %s82_s27 = int_to_ptr.vmem [resolvable:$true] %s81_s27  ;;  %s5712_s15 = int_to_ptr.vmem [resolvable:$true] %s105_s15 }
  0x6b   :  { %s5397_s28 = scalar_lea.hbm %s6316_s5, 512 }
  0x6c   :  { %p5398_p6 = scmp.ne.s32.totalorder %s6316_s5, %s5397_s28  ;;  %p5401_p7 = scmp.lt.u32.totalorder %s5397_s28, %s6316_s5 }
  0x6e   :  { %p5403_p8 = pnand %p5401_p7, %p5398_p6 }
  0x70   :  { %5406 = shalt.err (!%p5403_p8)
}
  0x71   :  { %s5407_s2 = scalar_lea.vmem %s82_s27, 512  ;;  %p5412_p10 = scmp.lt.s32.totalorder %s82_s27, %s82_s27 }
  0x72   :  { %p5408_p9 = scmp.ne.s32.totalorder %s82_s27, %s5407_s2  ;;  %p5413_p11 = scmp.lt.s32.totalorder %s5407_s2, %s5407_s2 }
  0x74   :  { %p5414_p12 = por %p5413_p11, %p5412_p10 }
  0x76   :  { %p5415_p13 = pnand %p5414_p12, %p5408_p9 }
  0x78   :  { %5418 = shalt.err (!%p5415_p13)
}
  0x79   :  { %87 = dma.hbm_to_vmem [thread:$0]  %s6316_s5, 512, %s82_s27, [#allocation9], %s5523_s25, %s5523_s25, %s5524_s26  }
  0x7a   :  { %s5419_s1 = scalar_lea.hbm %s6319_s8, 512 }
  0x7b   :  { %p5420_p0 = scmp.ne.s32.totalorder %s6319_s8, %s5419_s1  ;;  %p5423_p1 = scmp.lt.u32.totalorder %s5419_s1, %s6319_s8 }
  0x7d   :  { %p5425_p2 = pnand %p5423_p1, %p5420_p0 }
  0x7f   :  { %5428 = shalt.err (!%p5425_p2)
}
  0x80   :  { %s5429_s29 = scalar_lea.vmem %s5712_s15, 512  ;;  %p5434_p4 = scmp.lt.s32.totalorder %s5712_s15, %s5712_s15 }
  0x81   :  { %p5430_p3 = scmp.ne.s32.totalorder %s5712_s15, %s5429_s29  ;;  %p5435_p5 = scmp.lt.s32.totalorder %s5429_s29, %s5429_s29 }
  0x83   :  { %p5436_p6 = por %p5435_p5, %p5434_p4 }
  0x85   :  { %p5437_p7 = pnand %p5436_p6, %p5430_p3 }
  0x87   :  { %5440 = shalt.err (!%p5437_p7)
}
  0x88   :  { %111 = dma.hbm_to_vmem [thread:$0]  %s6319_s8, 512, %s5712_s15, [#allocation12], %s5523_s25, %s5523_s25, %s5524_s26  }
  0x89   :  { %s5531_s17 = smov [#allocation16]   ;;  %s5532_s28 = smov [#allocation17]  }
  0x8a   :  { %s127_s9 = sshll.u32 %s5531_s17, 4  ;;  %s140_s18 = sshll.u32 %s5532_s28, 4  ;;  %s128_s9 = int_to_ptr.vmem [resolvable:$true] %s127_s9  ;;  %s141_s18 = int_to_ptr.vmem [resolvable:$true] %s140_s18 }
  0x8b   :  { %s5441_s6 = scalar_lea.hbm %s6321_s10, 512 }
  0x8c   :  { %p5442_p8 = scmp.ne.s32.totalorder %s6321_s10, %s5441_s6  ;;  %p5445_p9 = scmp.lt.u32.totalorder %s5441_s6, %s6321_s10 }
  0x8e   :  { %p5447_p10 = pnand %p5445_p9, %p5442_p8 }
  0x90   :  { %5450 = shalt.err (!%p5447_p10)
}
  0x91   :  { %s5451_s8 = scalar_lea.vmem %s128_s9, 512  ;;  %p5456_p12 = scmp.lt.s32.totalorder %s128_s9, %s128_s9 }
  0x92   :  { %p5452_p11 = scmp.ne.s32.totalorder %s128_s9, %s5451_s8  ;;  %p5457_p13 = scmp.lt.s32.totalorder %s5451_s8, %s5451_s8 }
  0x94   :  { %p5458_p0 = por %p5457_p13, %p5456_p12 }
  0x96   :  { %p5459_p1 = pnand %p5458_p0, %p5452_p11 }
  0x98   :  { %5462 = shalt.err (!%p5459_p1)
}
  0x99   :  { %133 = dma.hbm_to_vmem [thread:$0]  %s6321_s10, 512, %s128_s9, [#allocation15], %s5523_s25, %s5523_s25, %s5524_s26  }
  0x9a   :  { %s5463_s0 = scalar_lea.hbm %s6322_s11, 16 }
  0x9b   :  { %p5464_p2 = scmp.ne.s32.totalorder %s6322_s11, %s5463_s0  ;;  %p5467_p3 = scmp.lt.u32.totalorder %s5463_s0, %s6322_s11 }
  0x9d   :  { %p5469_p4 = pnand %p5467_p3, %p5464_p2 }
  0x9f   :  { %5472 = shalt.err (!%p5469_p4)
}
  0xa0   :  { %s5473_s27 = scalar_lea.vmem %s141_s18, 16  ;;  %s5477_s17 = scalar_lea.vmem %s141_s18, 32 }
  0xa1   :  { %p5474_p5 = scmp.ne.s32.totalorder %s141_s18, %s5473_s27  ;;  %p5478_p6 = scmp.lt.s32.totalorder %s141_s18, %s141_s18 }
  0xa2   :  { %p5479_p7 = scmp.lt.s32.totalorder %s5477_s17, %s5473_s27 }
  0xa4   :  { %p5480_p8 = por %p5479_p7, %p5478_p6 }
  0xa6   :  { %p5481_p9 = pnand %p5480_p8, %p5474_p5 }
  0xa8   :  { %5484 = shalt.err (!%p5481_p9)
}
  0xa9   :  { %143 = dma.hbm_to_vmem [thread:$0]  %s6322_s11, 16, %s141_s18, [#allocation18]  }
  0xaa   :  { %5507 = dma.done.wait [#allocation3], 256  }
  0xab   :  { %5508 = vsyncadd [#allocation3], 4294967040 }
  0xac   :  { %5509 = dma.done.wait [#allocation6], 768  }
  0xad   :  { %5510 = vsyncadd [#allocation6], 4294966528 }
  0xae   :  { %5511 = dma.done.wait [#allocation9], 1024  }
  0xaf   :  { %5512 = vsyncadd [#allocation9], 4294966272 }
  0xb0   :  { %5513 = dma.done.wait [#allocation12], 528  }
  0xb1   :  { %5514 = vsyncadd [#allocation12], 4294966768 }
  0xb2   :  { %5515 = dma.done.wait [#allocation15], 528  }
  0xb3   :  { %5516 = vsyncadd [#allocation15], 4294966768 }
  0xb4   :  { %5517 = dma.done.wait [#allocation18], 16  }
  0xb5   :  { %5518 = vsyncadd [#allocation18], 4294967280  ;;  %v5533_v0 = vmov 0.0|0.0   ;;  %vm5534_vm0 = vmmov 0   ;;  %v5535_v1 = vmov 0.0   ;;  %vm189_vm1 = vcmask 130048  }
  0xb6   :  { %4759 = vmatprep.subr.bf16.mxu1 %v5533_v0  ;;  %4312 = vmatprep.mubr.msk.f32.mxu1 %vm5534_vm0, %v5535_v1  ;;  %v180_v2 = vld [vmem:[#allocation5] sm:$0xff]  ;;  %v181_v3 = vld [vmem:[#allocation5 + $0x8] sm:$0xff]  ;;  %v271_v4 = vld [vmem:[#allocation7] sm:$0xff]  ;;  %vm277_vm2 = vcmask 261120   ;;  %s5536_s18 = smov 64   ;;  %vm3991_vm3 = vcmask 484352  }
  0xb7   :  { %v4755_v5 = vpack.c.bf16 %v181_v3, %v180_v2  ;;  %v272_v6 = vld [vmem:[#allocation7 + $0x8] sm:$0xff]  ;;  %v178_v7 = vld [vmem:[#allocation2] sm:$0xff]  ;;  %v273_v9 = vld [vmem:[#allocation7 + $0x10] sm:$0xff] }
  0xb8   :  { %v5779_v8 = vpack.c.bf16 %v272_v6, %v271_v4  ;;  %4301 = vmatprep.mubr.msk.f32.mxu0 %vm189_vm1, %v178_v7  ;;  %v274_v10 = vld [vmem:[#allocation7 + $0x18] sm:$0xff]  ;;  %v179_v11 = vld [vmem:[#allocation2 + $0x8] sm:$0xff]  ;;  %v275_v13 = vld [vmem:[%s6323_s12] sm:$0x3] }
  0xb9   :  { %4756 = vmatprep.subr.bf16.mxu0 %v4755_v5  ;;  %v5783_v12 = vpack.c.bf16 %v274_v10, %v273_v9  ;;  %v4013_v14 = vld [vmem:[%s6314_s3] ss:$0 sm:$0xff]  ;;  %s5537_s3 = smov 32  }
  0xba   :  { %4761 = vmatpush3.bf16.msra.mxu1 %v5779_v8  ;;  %4758 = vmatpush3.bf16.msra.mxu0 %v4755_v5  ;;  %v276_v23 = vld [vmem:[%s6324_s13] sm:$0x3] }
  0xbb   :  { %4762 = vmatprep.subr.bf16.mxu1 %v5533_v0  ;;  %4765 = vmatprep.subr.bf16.mxu0 %v5533_v0 }
  0xbd   :  { %4302 = vmatmul.mubr.msk.f32.vlgmr.msra.gmra.mrb[0].mxu0 %vm189_vm1, %v179_v11 }
  0xbe   :  { %4764 = vmatpush3.bf16.msra.mxu1 %v5783_v12  ;;  %4767 = vmatpush3.bf16.msra.mxu0 %v5779_v8 }
  0xbf   :  { %4768 = vmatprep.subr.bf16.mxu0 %v5533_v0  ;;  %4323 = vmatprep.mubr.msk.f32.mxu0 %vm5534_vm0, %v5535_v1 }
  0xc0   :  { %4771 = vmatprep.subr.bf16.mxu1 %v5533_v0 }
  0xc1   :  { %4313 = vmatmul.mubr.msk.f32.vlgmr.msra.gmra.mrb[0].mxu1 %vm277_vm2, %v275_v13 }
  0xc2   :  { %4770 = vmatpush3.bf16.msra.mxu0 %v5783_v12  ;;  %4773 = vmatpush3.bf16.msra.mxu1 %v5779_v8 }
  0xc3   :  { %4774 = vmatprep.subr.bf16.mxu1 %v5533_v0  ;;  %4334 = vmatprep.mubr.msk.f32.mxu1 %vm5534_vm0, %v5535_v1 }
  0xc4   :  { %4777 = vmatprep.subr.bf16.mxu0 %v5533_v0 }
  0xc6   :  { %4776 = vmatpush3.bf16.msra.mxu1 %v5783_v12 }
  0xc7   :  { %4783 = vmatprep.subr.bf16.mxu1 %v5533_v0 }
 0x190   :  { %v4303_v15 = vpop.f32.mrb[0].mxu0 }
 0x191   :  { %v5809_v16 = vadd.f32 %v4303_v15, %v4013_v14  ;;  %v262_v17 = vpop.f32.mrb[1].mxu0 }
 0x192   :  { %v5811_v18 = vadd.f32 %v4013_v14, %v262_v17 }
 0x194   :  { %v347_v19 = vpop.f32.mrb[0].mxu1 }
 0x195   :  { %v351_v20 = vadd.f32 %v347_v19, %v5811_v18  ;;  %v4314_v21 = vpop.f32.mrb[1].mxu1 }
 0x197   :  { %5071 = vtanh.f32 %v351_v20  ;;  %v4017_v24 = vmul.f32 -1.442695, %v351_v20 }
 0x199   :  { %5073 = vpow2.f32 %v4017_v24 }
 0x1a1   :  { %v5072_v22 = vpop.eup %5071 }
 0x1a2   :  { %365 = vrot.lane.b32.xlu0 %v5072_v22, %s5536_s18 }
 0x1a3   :  { %v5074_v25 = vpop.eup %5073 }
 0x1a4   :  { %v355_v26 = vadd.f32 1.0, %v5074_v25 }
 0x1a6   :  { %360 = vrot.lane.b32.xlu0 %v276_v23, %s5537_s3  ;;  %5075 = vrcp.f32 %v355_v26 }
 0x1b0   :  { %v5076_v27 = vpop.eup %5075 }
 0x214   :  { %v366_v28 = vpop.permute.xlu0 %365 }
 0x215   :  { %v368_v29 = vmul.f32 %v5076_v27, %v366_v28 }
 0x217   :  { %370 = vrot.lane.b32.xlu1 %v368_v29, %s5537_s3 }
 0x218   :  { %v361_v30 = vpop.permute.xlu0 %360 }
 0x219   :  { %v363_v31 = vmul.f32 %v5076_v27, %v361_v30 }
 0x289   :  { %v371_v32 = vpop.permute.xlu1 %370 }
 0x28a   :  { %v373_v33 = vadd.f32 %v371_v32, %v363_v31 }
 0x28c   :  { %5077 = vtanh.f32 %v373_v33  ;;  %v467_v49 = vrot.slane %v373_v33, 6 }
 0x296   :  { %v5078_v34 = vpop.eup %5077 }
 0x297   :  { %376 = vrot.lane.b32.xlu1 %v5078_v34, %s5536_s18 }
 0x309   :  { %v377_v35 = vpop.permute.xlu1 %376 }
 0x30a   :  { %v379_v36 = vmul.f32 %v5076_v27, %v377_v35 }
 0x30c   :  { %381 = vrot.lane.b32.xlu0 %v379_v36, %s5537_s3 }
 0x37e   :  { %v5822_v37 = vpop.permute.xlu0 %381 }
 0x37f   :  { %4324 = vmatmul.mubr.msk.f32.vlgmr.msra.gmra.mrb[2].mxu0 %vm277_vm2, %v5822_v37 }
 0x380   :  { %4779 = vmatpush3.bf16.msra.mxu0 %v5779_v8  ;;  %4345 = vmatprep.mubr.msk.f32.mxu0 %vm5534_vm0, %v5535_v1 }
 0x381   :  { %4780 = vmatprep.subr.bf16.mxu0 %v5533_v0 }
 0x384   :  { %4782 = vmatpush3.bf16.msra.mxu0 %v5783_v12 }
 0x385   :  { %4789 = vmatprep.subr.bf16.mxu0 %v5533_v0 }
 0x452   :  { %v451_v38 = vpop.f32.mrb[2].mxu0 }
 0x453   :  { %v456_v39 = vrot.slane %v451_v38, 6  ;;  %v4325_v40 = vpop.f32.mrb[3].mxu0 }
 0x455   :  { %v458_v41 = vadd.f32 %v456_v39, %v5811_v18 }
 0x457   :  { %5079 = vtanh.f32 %v458_v41  ;;  %v4019_v43 = vmul.f32 -1.442695, %v458_v41 }
 0x459   :  { %5081 = vpow2.f32 %v4019_v43 }
 0x461   :  { %v5080_v42 = vpop.eup %5079 }
 0x462   :  { %471 = vrot.lane.b32.xlu1 %v5080_v42, %s5536_s18 }
 0x463   :  { %v5082_v44 = vpop.eup %5081 }
 0x464   :  { %v462_v45 = vadd.f32 1.0, %v5082_v44 }
 0x466   :  { %5083 = vrcp.f32 %v462_v45 }
 0x470   :  { %v5084_v46 = vpop.eup %5083 }
 0x471   :  { %v469_v50 = vmul.f32 %v5084_v46, %v467_v49 }
 0x4d4   :  { %v472_v47 = vpop.permute.xlu1 %471 }
 0x4d5   :  { %v474_v48 = vmul.f32 %v5084_v46, %v472_v47 }
 0x4d7   :  { %476 = vrot.lane.b32.xlu0 %v474_v48, %s5537_s3 }
 0x549   :  { %v477_v51 = vpop.permute.xlu0 %476 }
 0x54a   :  { %v479_v52 = vadd.f32 %v477_v51, %v469_v50 }
 0x54c   :  { %5085 = vtanh.f32 %v479_v52  ;;  %v574_v7 = vrot.slane %v479_v52, 6 }
 0x556   :  { %v5086_v53 = vpop.eup %5085 }
 0x557   :  { %482 = vrot.lane.b32.xlu1 %v5086_v53, %s5536_s18 }
 0x5c9   :  { %v483_v54 = vpop.permute.xlu1 %482 }
 0x5ca   :  { %v485_v55 = vmul.f32 %v5084_v46, %v483_v54 }
 0x5cc   :  { %v487_v56 = vrot.slane %v485_v55, 2 }
 0x5ce   :  { %488 = vrot.lane.b32.xlu0 %v487_v56, %s5537_s3 }
 0x640   :  { %v5837_v57 = vpop.permute.xlu0 %488 }
 0x641   :  { %4335 = vmatmul.mubr.msk.f32.vlgmr.msra.gmra.mrb[2].mxu1 %vm277_vm2, %v5837_v57 }
 0x642   :  { %4785 = vmatpush3.bf16.msra.mxu1 %v5779_v8  ;;  %4356 = vmatprep.mubr.msk.f32.mxu1 %vm5534_vm0, %v5535_v1 }
 0x643   :  { %4786 = vmatprep.subr.bf16.mxu1 %v5533_v0 }
 0x646   :  { %4788 = vmatpush3.bf16.msra.mxu1 %v5783_v12 }
 0x647   :  { %4795 = vmatprep.subr.bf16.mxu1 %v5533_v0 }
 0x714   :  { %v558_v58 = vpop.f32.mrb[2].mxu1 }
 0x715   :  { %v563_v59 = vrot.slane %v558_v58, 4  ;;  %v4336_v60 = vpop.f32.mrb[3].mxu1 }
 0x717   :  { %v565_v61 = vadd.f32 %v563_v59, %v5811_v18 }
 0x719   :  { %5087 = vtanh.f32 %v565_v61  ;;  %v4021_v63 = vmul.f32 -1.442695, %v565_v61 }
 0x71b   :  { %5089 = vpow2.f32 %v4021_v63 }
 0x723   :  { %v5088_v62 = vpop.eup %5087 }
 0x724   :  { %578 = vrot.lane.b32.xlu1 %v5088_v62, %s5536_s18 }
 0x725   :  { %v5090_v2 = vpop.eup %5089 }
 0x726   :  { %v569_v3 = vadd.f32 1.0, %v5090_v2 }
 0x728   :  { %5091 = vrcp.f32 %v569_v3 }
 0x732   :  { %v5092_v4 = vpop.eup %5091 }
 0x733   :  { %v576_v9 = vmul.f32 %v5092_v4, %v574_v7 }
 0x796   :  { %v579_v5 = vpop.permute.xlu1 %578 }
 0x797   :  { %v581_v6 = vmul.f32 %v5092_v4, %v579_v5 }
 0x799   :  { %583 = vrot.lane.b32.xlu0 %v581_v6, %s5537_s3 }
 0x80b   :  { %v584_v10 = vpop.permute.xlu0 %583 }
 0x80c   :  { %v586_v11 = vadd.f32 %v584_v10, %v576_v9 }
 0x80e   :  { %5093 = vtanh.f32 %v586_v11  ;;  %v681_v31 = vrot.slane %v586_v11, 6 }
 0x818   :  { %v5094_v13 = vpop.eup %5093 }
 0x819   :  { %589 = vrot.lane.b32.xlu1 %v5094_v13, %s5536_s18 }
 0x88b   :  { %v590_v14 = vpop.permute.xlu1 %589 }
 0x88c   :  { %v592_v15 = vmul.f32 %v5092_v4, %v590_v14 }
 0x88e   :  { %v594_v17 = vrot.slane %v592_v15, 4 }
 0x890   :  { %595 = vrot.lane.b32.xlu0 %v594_v17, %s5537_s3  ;;  %v1124_v17 = vld [vmem:[#allocation8] sm:$0xff] }
 0x902   :  { %v5852_v19 = vpop.permute.xlu0 %595 }
 0x903   :  { %4346 = vmatmul.mubr.msk.f32.vlgmr.msra.gmra.mrb[4].mxu0 %vm277_vm2, %v5852_v19 }
 0x904   :  { %4791 = vmatpush3.bf16.msra.mxu0 %v5779_v8  ;;  %4367 = vmatprep.mubr.msk.f32.mxu0 %vm5534_vm0, %v5535_v1 }
 0x905   :  { %4792 = vmatprep.subr.bf16.mxu0 %v5533_v0 }
 0x908   :  { %4794 = vmatpush3.bf16.msra.mxu0 %v5783_v12 }
 0x909   :  { %4801 = vmatprep.subr.bf16.mxu0 %v5533_v0 }
 0x9d6   :  { %v665_v20 = vpop.f32.mrb[4].mxu0 }
 0x9d7   :  { %v670_v21 = vrot.slane %v665_v20, 2  ;;  %v4347_v22 = vpop.f32.mrb[5].mxu0  ;;  %v1125_v20 = vld [vmem:[#allocation8 + $0x8] sm:$0xff] }
 0x9d8   :  { %v1126_v22 = vld [vmem:[#allocation8 + $0x10] sm:$0xff] }
 0x9d9   :  { %v672_v23 = vadd.f32 %v670_v21, %v5811_v18  ;;  %v5894_v21 = vpack.c.bf16 %v1125_v20, %v1124_v17 }
 0x9db   :  { %5095 = vtanh.f32 %v672_v23  ;;  %v4023_v25 = vmul.f32 -1.442695, %v672_v23  ;;  %v1127_v23 = vld [vmem:[#allocation8 + $0x18] sm:$0xff] }
 0x9dd   :  { %5097 = vpow2.f32 %v4023_v25  ;;  %v5901_v25 = vpack.c.bf16 %v1127_v23, %v1126_v22 }
 0x9e5   :  { %v5096_v24 = vpop.eup %5095 }
 0x9e6   :  { %685 = vrot.lane.b32.xlu1 %v5096_v24, %s5536_s18 }
 0x9e7   :  { %v5098_v26 = vpop.eup %5097 }
 0x9e8   :  { %v676_v27 = vadd.f32 1.0, %v5098_v26 }
 0x9ea   :  { %5099 = vrcp.f32 %v676_v27 }
 0x9f4   :  { %v5100_v28 = vpop.eup %5099 }
 0x9f5   :  { %v683_v32 = vmul.f32 %v5100_v28, %v681_v31 }
 0xa58   :  { %v686_v29 = vpop.permute.xlu1 %685 }
 0xa59   :  { %v688_v30 = vmul.f32 %v5100_v28, %v686_v29 }
 0xa5b   :  { %690 = vrot.lane.b32.xlu0 %v688_v30, %s5537_s3 }
 0xacd   :  { %v691_v33 = vpop.permute.xlu0 %690 }
 0xace   :  { %v693_v34 = vadd.f32 %v691_v33, %v683_v32 }
 0xad0   :  { %5101 = vtanh.f32 %v693_v34  ;;  %v785_v50 = vrot.slane %v693_v34, 6 }
 0xada   :  { %v5102_v18 = vpop.eup %5101 }
 0xadb   :  { %696 = vrot.lane.b32.xlu1 %v5102_v18, %s5536_s18 }
 0xb4d   :  { %v697_v35 = vpop.permute.xlu1 %696 }
 0xb4e   :  { %v699_v36 = vmul.f32 %v5100_v28, %v697_v35 }
 0xb50   :  { %v701_v38 = vrot.slane %v699_v36, 6 }
 0xb52   :  { %702 = vrot.lane.b32.xlu0 %v701_v38, %s5537_s3 }
 0xbc4   :  { %v5867_v39 = vpop.permute.xlu0 %702 }
 0xbc5   :  { %4357 = vmatmul.mubr.msk.f32.vlgmr.msra.gmra.mrb[4].mxu1 %vm277_vm2, %v5867_v39 }
 0xbc6   :  { %4797 = vmatpush3.bf16.msra.mxu1 %v5779_v8  ;;  %4378 = vmatprep.mubr.msk.f32.mxu1 %vm5534_vm0, %v5535_v1 }
 0xbc7   :  { %4798 = vmatprep.subr.bf16.mxu1 %v5533_v0 }
 0xbca   :  { %4800 = vmatpush3.bf16.msra.mxu1 %v5783_v12 }
 0xbcb   :  { %4807 = vmatprep.subr.bf16.mxu1 %v5533_v0 }
 0xc98   :  { %v772_v40 = vpop.f32.mrb[4].mxu1 }
 0xc99   :  { %v776_v41 = vadd.f32 %v772_v40, %v5809_v16  ;;  %v4358_v42 = vpop.f32.mrb[5].mxu1 }
 0xc9b   :  { %5103 = vtanh.f32 %v776_v41  ;;  %v4025_v44 = vmul.f32 -1.442695, %v776_v41 }
 0xc9d   :  { %5105 = vpow2.f32 %v4025_v44  ;;  %v1701_v44 = vld [vmem:[#allocation10] sm:$0xff] }
 0xca5   :  { %v5104_v43 = vpop.eup %5103 }
 0xca6   :  { %789 = vrot.lane.b32.xlu1 %v5104_v43, %s5536_s18 }
 0xca7   :  { %v5106_v45 = vpop.eup %5105 }
 0xca8   :  { %v780_v46 = vadd.f32 1.0, %v5106_v45  ;;  %v1702_v45 = vld [vmem:[#allocation10 + $0x8] sm:$0xff] }
 0xcaa   :  { %5107 = vrcp.f32 %v780_v46  ;;  %v5939_v46 = vpack.c.bf16 %v1702_v45, %v1701_v44 }
 0xcb4   :  { %v5108_v47 = vpop.eup %5107 }
 0xcb5   :  { %v787_v51 = vmul.f32 %v5108_v47, %v785_v50 }
 0xd18   :  { %v790_v48 = vpop.permute.xlu1 %789 }
 0xd19   :  { %v792_v49 = vmul.f32 %v5108_v47, %v790_v48  ;;  %v1704_v48 = vld [vmem:[#allocation10 + $0x18] sm:$0xff] }
 0xd1b   :  { %794 = vrot.lane.b32.xlu0 %v792_v49, %s5537_s3 }
 0xd8d   :  { %v795_v52 = vpop.permute.xlu0 %794 }
 0xd8e   :  { %v797_v53 = vadd.f32 %v795_v52, %v787_v51  ;;  %v4041_v51 = vld [vmem:[%s6323_s12 + $0x2] sm:$0x3] }
 0xd90   :  { %5109 = vtanh.f32 %v797_v53 }
 0xd9a   :  { %v5110_v54 = vpop.eup %5109 }
 0xd9b   :  { %800 = vrot.lane.b32.xlu1 %v5110_v54, %s5536_s18  ;;  %v5992_v54 = vld [vmem:[#allocation11] ss:$0 sm:$0xff] }
 0xe0d   :  { %v801_v55 = vpop.permute.xlu1 %800 }
 0xe0e   :  { %v803_v56 = vmul.f32 %v5108_v47, %v801_v55  ;;  %v1703_v47 = vld [vmem:[#allocation10 + $0x10] sm:$0xff] }
 0xe0f   :  { %v5945_v50 = vpack.c.bf16 %v1704_v48, %v1703_v47 }
 0xe10   :  { %805 = vrot.lane.b32.xlu0 %v803_v56, %s5537_s3 }
 0xe82   :  { %v806_v58 = vpop.permute.xlu0 %805 }
 0xe83   :  { %4368 = vmatmul.mubr.msk.f32.vlgmr.msra.gmra.mrb[6].mxu0 %vm277_vm2, %v806_v58 }
 0xe84   :  { %4803 = vmatpush3.bf16.msra.mxu0 %v5779_v8  ;;  %4389 = vmatprep.mubr.msk.f32.mxu0 %vm5534_vm0, %v5535_v1 }
 0xe85   :  { %4804 = vmatprep.subr.bf16.mxu0 %v5533_v0 }
 0xe88   :  { %4806 = vmatpush3.bf16.msra.mxu0 %v5783_v12  ;;  %v891_v12 = vrot.slane %v797_v53, 6 }
 0xe89   :  { %4813 = vmatprep.subr.bf16.mxu0 %v5533_v0 }
 0xf56   :  { %v875_v59 = vpop.f32.mrb[6].mxu0 }
 0xf57   :  { %v880_v60 = vrot.slane %v875_v59, 6  ;;  %v4369_v61 = vpop.f32.mrb[7].mxu0 }
 0xf58   :  { %v4042_v61 = vld [vmem:[%s6324_s13 + $0x2] sm:$0x3] }
 0xf59   :  { %v882_v62 = vadd.f32 %v880_v60, %v5809_v16 }
 0xf5b   :  { %5111 = vtanh.f32 %v882_v62  ;;  %v4027_v2 = vmul.f32 -1.442695, %v882_v62 }
 0xf5d   :  { %5113 = vpow2.f32 %v4027_v2 }
 0xf65   :  { %v5112_v63 = vpop.eup %5111 }
 0xf66   :  { %895 = vrot.lane.b32.xlu1 %v5112_v63, %s5536_s18 }
 0xf67   :  { %v5114_v8 = vpop.eup %5113 }
 0xf68   :  { %v886_v3 = vadd.f32 1.0, %v5114_v8 }
 0xf6a   :  { %5115 = vrcp.f32 %v886_v3 }
 0xf74   :  { %v5116_v4 = vpop.eup %5115 }
 0xf75   :  { %v893_v7 = vmul.f32 %v5116_v4, %v891_v12 }
 0xfd8   :  { %v896_v5 = vpop.permute.xlu1 %895 }
 0xfd9   :  { %v898_v6 = vmul.f32 %v5116_v4, %v896_v5 }
 0xfdb   :  { %900 = vrot.lane.b32.xlu0 %v898_v6, %s5537_s3 }
0x104d   :  { %v901_v9 = vpop.permute.xlu0 %900 }
0x104e   :  { %v903_v10 = vadd.f32 %v901_v9, %v893_v7 }
0x1050   :  { %5117 = vtanh.f32 %v903_v10  ;;  %v998_v18 = vrot.slane %v903_v10, 6 }
0x105a   :  { %v5118_v11 = vpop.eup %5117 }
0x105b   :  { %906 = vrot.lane.b32.xlu1 %v5118_v11, %s5536_s18 }
0x10cd   :  { %v907_v13 = vpop.permute.xlu1 %906 }
0x10ce   :  { %v909_v14 = vmul.f32 %v5116_v4, %v907_v13 }
0x10d0   :  { %v911_v15 = vrot.slane %v909_v14, 2 }
0x10d2   :  { %912 = vrot.lane.b32.xlu0 %v911_v15, %s5537_s3 }
0x1144   :  { %v5896_v24 = vpop.permute.xlu0 %912 }
0x1145   :  { %4379 = vmatmul.mubr.msk.f32.vlgmr.msra.gmra.mrb[6].mxu1 %vm277_vm2, %v5896_v24 }
0x1146   :  { %4809 = vmatpush3.bf16.msra.mxu1 %v5894_v21  ;;  %4400 = vmatprep.mubr.msk.f32.mxu1 %vm5534_vm0, %v5535_v1 }
0x1147   :  { %4810 = vmatprep.subr.bf16.mxu1 %v5533_v0 }
0x114a   :  { %4812 = vmatpush3.bf16.msra.mxu1 %v5901_v25 }
0x114b   :  { %4819 = vmatprep.subr.bf16.mxu1 %v5533_v0 }
0x114d   :  { %4401 = vmatmul.mubr.msk.f32.vlgmr.msra.gmra.mrb[8].mxu1 %vm277_vm2, %v5822_v37 }
0x114e   :  { %4821 = vmatpush3.bf16.msra.mxu1 %v5894_v21  ;;  %4422 = vmatprep.mubr.msk.f32.mxu1 %vm5534_vm0, %v5535_v1 }
0x114f   :  { %4822 = vmatprep.subr.bf16.mxu1 %v5533_v0 }
0x1152   :  { %4824 = vmatpush3.bf16.msra.mxu1 %v5901_v25 }
0x1153   :  { %4831 = vmatprep.subr.bf16.mxu1 %v5533_v0 }
0x1155   :  { %4423 = vmatmul.mubr.msk.f32.vlgmr.msra.gmra.mrb[10].mxu1 %vm277_vm2, %v5852_v19 }
0x1156   :  { %4833 = vmatpush3.bf16.msra.mxu1 %v5894_v21  ;;  %4444 = vmatprep.mubr.msk.f32.mxu1 %vm5534_vm0, %v5535_v1 }
0x1157   :  { %4834 = vmatprep.subr.bf16.mxu1 %v5533_v0 }
0x115a   :  { %4836 = vmatpush3.bf16.msra.mxu1 %v5901_v25 }
0x115b   :  { %4843 = vmatprep.subr.bf16.mxu1 %v5533_v0 }
0x115d   :  { %4445 = vmatmul.mubr.msk.f32.vlgmr.msra.gmra.mrb[12].mxu1 %vm277_vm2, %v806_v58 }
0x115e   :  { %4845 = vmatpush3.bf16.msra.mxu1 %v5894_v21  ;;  %4466 = vmatprep.mubr.msk.f32.mxu1 %vm5534_vm0, %v5535_v1 }
0x115f   :  { %4846 = vmatprep.subr.bf16.mxu1 %v5533_v0 }
0x1162   :  { %4848 = vmatpush3.bf16.msra.mxu1 %v5901_v25 }
0x1163   :  { %4855 = vmatprep.subr.bf16.mxu1 %v5533_v0 }
0x1218   :  { %v982_v37 = vpop.f32.mrb[6].mxu1 }
0x1219   :  { %v987_v19 = vrot.slane %v982_v37, 4  ;;  %v4380_v26 = vpop.f32.mrb[7].mxu1 }
0x121b   :  { %v989_v27 = vadd.f32 %v987_v19, %v5809_v16 }
0x121d   :  { %5119 = vtanh.f32 %v989_v27  ;;  %v4029_v29 = vmul.f32 -1.442695, %v989_v27 }
0x121f   :  { %5121 = vpow2.f32 %v4029_v29 }
0x1227   :  { %v5120_v28 = vpop.eup %5119 }
0x1228   :  { %1002 = vrot.lane.b32.xlu1 %v5120_v28, %s5536_s18 }
0x1229   :  { %v5122_v30 = vpop.eup %5121 }
0x122a   :  { %v993_v31 = vadd.f32 1.0, %v5122_v30 }
0x122c   :  { %5123 = vrcp.f32 %v993_v31 }
0x1236   :  { %v5124_v32 = vpop.eup %5123 }
0x1237   :  { %v1000_v35 = vmul.f32 %v5124_v32, %v998_v18 }
0x129a   :  { %v1003_v33 = vpop.permute.xlu1 %1002 }
0x129b   :  { %v1005_v34 = vmul.f32 %v5124_v32, %v1003_v33 }
0x129d   :  { %1007 = vrot.lane.b32.xlu0 %v1005_v34, %s5537_s3 }
0x130f   :  { %v1008_v36 = vpop.permute.xlu0 %1007 }
0x1310   :  { %v5934_v38 = vadd.f32 %v1008_v36, %v1000_v35 }
0x1312   :  { %5125 = vtanh.f32 %v5934_v38  ;;  %v1105_v10 = vrot.slane %v5934_v38, 6 }
0x131c   :  { %v5126_v40 = vpop.eup %5125 }
0x131d   :  { %1013 = vrot.lane.b32.xlu1 %v5126_v40, %s5536_s18 }
0x138f   :  { %v1014_v41 = vpop.permute.xlu1 %1013 }
0x1390   :  { %v1016_v42 = vmul.f32 %v5124_v32, %v1014_v41 }
0x1392   :  { %v1018_v43 = vrot.slane %v1016_v42, 4 }
0x1394   :  { %1019 = vrot.lane.b32.xlu0 %v1018_v43, %s5537_s3 }
0x1406   :  { %v1020_v49 = vpop.permute.xlu0 %1019 }
0x1407   :  { %4390 = vmatmul.mubr.msk.f32.vlgmr.msra.gmra.mrb[8].mxu0 %vm277_vm2, %v1020_v49  ;;  %4467 = vmatmul.mubr.msk.f32.vlgmr.msra.gmra.mrb[14].mxu1 %vm277_vm2, %v1020_v49 }
0x1408   :  { %4815 = vmatpush3.bf16.msra.mxu0 %v5894_v21  ;;  %4857 = vmatpush3.bf16.msra.mxu1 %v5939_v46 }
0x1409   :  { %4816 = vmatprep.subr.bf16.mxu0 %v5533_v0  ;;  %4858 = vmatprep.subr.bf16.mxu1 %v5533_v0 }
0x140a   :  { %4411 = vmatprep.mubr.msk.f32.mxu0 %vm5534_vm0, %v5535_v1  ;;  %4488 = vmatprep.mubr.msk.f32.mxu1 %vm5534_vm0, %v5535_v1 }
0x140c   :  { %4818 = vmatpush3.bf16.msra.mxu0 %v5901_v25  ;;  %4860 = vmatpush3.bf16.msra.mxu1 %v5945_v50 }
0x140d   :  { %4825 = vmatprep.subr.bf16.mxu0 %v5533_v0  ;;  %4867 = vmatprep.subr.bf16.mxu1 %v5533_v0 }
0x140f   :  { %4412 = vmatmul.mubr.msk.f32.vlgmr.msra.gmra.mrb[10].mxu0 %vm277_vm2, %v5837_v57  ;;  %4489 = vmatmul.mubr.msk.f32.vlgmr.msra.gmra.mrb[8].mxu1 %vm277_vm2, %v4041_v51 }
0x1410   :  { %4827 = vmatpush3.bf16.msra.mxu0 %v5894_v21  ;;  %4433 = vmatprep.mubr.msk.f32.mxu0 %vm5534_vm0, %v5535_v1 }
0x1411   :  { %4828 = vmatprep.subr.bf16.mxu0 %v5533_v0  ;;  %4869 = vmatpush3.bf16.msra.mxu1 %v5939_v46 }
0x1412   :  { %4870 = vmatprep.subr.bf16.mxu1 %v5533_v0  ;;  %4510 = vmatprep.mubr.msk.f32.mxu1 %vm5534_vm0, %v5535_v1 }
0x1414   :  { %4830 = vmatpush3.bf16.msra.mxu0 %v5901_v25 }
0x1415   :  { %4837 = vmatprep.subr.bf16.mxu0 %v5533_v0  ;;  %4872 = vmatpush3.bf16.msra.mxu1 %v5945_v50 }
0x1416   :  { %4879 = vmatprep.subr.bf16.mxu1 %v5533_v0 }
0x1417   :  { %4434 = vmatmul.mubr.msk.f32.vlgmr.msra.gmra.mrb[12].mxu0 %vm277_vm2, %v5867_v39 }
0x1418   :  { %4839 = vmatpush3.bf16.msra.mxu0 %v5894_v21  ;;  %4455 = vmatprep.mubr.msk.f32.mxu0 %vm5534_vm0, %v5535_v1 }
0x1419   :  { %4840 = vmatprep.subr.bf16.mxu0 %v5533_v0 }
0x141c   :  { %4842 = vmatpush3.bf16.msra.mxu0 %v5901_v25 }
0x141d   :  { %4849 = vmatprep.subr.bf16.mxu0 %v5533_v0 }
0x141f   :  { %4456 = vmatmul.mubr.msk.f32.vlgmr.msra.gmra.mrb[14].mxu0 %vm277_vm2, %v5896_v24 }
0x1420   :  { %4851 = vmatpush3.bf16.msra.mxu0 %v5894_v21  ;;  %4477 = vmatprep.mubr.msk.f32.mxu0 %vm5534_vm0, %v5535_v1 }
0x1421   :  { %4852 = vmatprep.subr.bf16.mxu0 %v5533_v0 }
0x1424   :  { %4854 = vmatpush3.bf16.msra.mxu0 %v5901_v25 }
0x1425   :  { %4861 = vmatprep.subr.bf16.mxu0 %v5533_v0 }
0x14da   :  { %v1089_v57 = vpop.f32.mrb[8].mxu0 }
0x14db   :  { %v1094_v39 = vrot.slane %v1089_v57, 2  ;;  %v4391_v52 = vpop.f32.mrb[9].mxu0 }
0x14dd   :  { %v1096_v53 = vadd.f32 %v1094_v39, %v5809_v16 }
0x14df   :  { %5127 = vtanh.f32 %v1096_v53  ;;  %v4031_v16 = vmul.f32 -1.442695, %v1096_v53 }
0x14e2   :  { %v1778_v55 = vpop.f32.mrb[8].mxu1 }
0x14e3   :  { %v5005_v56 = vadd.f32 %v5992_v54, %v1778_v55  ;;  %v4490_v58 = vpop.f32.mrb[9].mxu1 }
0x14e5   :  { %5129 = vtanh.f32 %v5005_v56  ;;  %v4044_v62 = vmul.f32 -1.442695, %v5005_v56 }
0x14e6   :  { %5131 = vpow2.f32 %v4031_v16 }
0x14e7   :  { %5133 = vpow2.f32 %v4044_v62 }
0x14e9   :  { %v5128_v59 = vpop.eup %5127 }
0x14ea   :  { %1109 = vrot.lane.b32.xlu1 %v5128_v59, %s5536_s18 }
0x14ef   :  { %v5130_v60 = vpop.eup %5129 }
0x14f0   :  { %1796 = vrot.lane.b32.xlu0 %v5130_v60, %s5536_s18  ;;  %v5132_v63 = vpop.eup %5131 }
0x14f1   :  { %v1100_v2 = vadd.f32 1.0, %v5132_v63  ;;  %v5134_v8 = vpop.eup %5133 }
0x14f2   :  { %v1786_v3 = vadd.f32 1.0, %v5134_v8 }
0x14f3   :  { %5135 = vrcp.f32 %v1100_v2 }
0x14f4   :  { %1791 = vrot.lane.b32.xlu0 %v4042_v61, %s5537_s3  ;;  %5137 = vrcp.f32 %v1786_v3 }
0x14fd   :  { %v5136_v4 = vpop.eup %5135 }
0x14fe   :  { %v5138_v12 = vpop.eup %5137  ;;  %v1107_v11 = vmul.f32 %v5136_v4, %v1105_v10 }
0x155c   :  { %v1110_v5 = vpop.permute.xlu1 %1109 }
0x155d   :  { %v1112_v6 = vmul.f32 %v5136_v4, %v1110_v5 }
0x155f   :  { %1114 = vrot.lane.b32.xlu1 %v1112_v6, %s5537_s3 }
0x1562   :  { %v1797_v7 = vpop.permute.xlu0 %1796 }
0x1563   :  { %v1799_v9 = vmul.f32 %v5138_v12, %v1797_v7 }
0x1565   :  { %1801 = vrot.lane.b32.xlu1 %v1799_v9, %s5537_s3 }
0x1566   :  { %v1792_v15 = vpop.permute.xlu0 %1791 }
0x1567   :  { %v1794_v17 = vmul.f32 %v5138_v12, %v1792_v15 }
0x15d1   :  { %v1115_v13 = vpop.permute.xlu1 %1114 }
0x15d2   :  { %v1117_v14 = vadd.f32 %v1115_v13, %v1107_v11 }
0x15d4   :  { %5139 = vtanh.f32 %v1117_v14 }
0x15d7   :  { %v1802_v20 = vpop.permute.xlu1 %1801 }
0x15d8   :  { %v1804_v21 = vadd.f32 %v1802_v20, %v1794_v17 }
0x15da   :  { %5141 = vtanh.f32 %v1804_v21 }
0x15de   :  { %v5140_v22 = vpop.eup %5139 }
0x15df   :  { %1120 = vrot.lane.b32.xlu0 %v5140_v22, %s5536_s18 }
0x15e4   :  { %v5142_v23 = vpop.eup %5141 }
0x15e5   :  { %1807 = vrot.lane.b32.xlu1 %v5142_v23, %s5536_s18 }
0x1651   :  { %v1121_v24 = vpop.permute.xlu0 %1120 }
0x1652   :  { %v1123_v25 = vmul.f32 %v5136_v4, %v1121_v24 }
0x1654   :  { %v1626_v37 = vrot.slane %v1123_v25, 6 }
0x1656   :  { %1627 = vrot.lane.b32.xlu0 %v1626_v37, %s5537_s3 }
0x1657   :  { %v1808_v19 = vpop.permute.xlu1 %1807 }
0x1658   :  { %v1810_v26 = vmul.f32 %v5138_v12, %v1808_v19 }
0x165a   :  { %1812 = vrot.lane.b32.xlu1 %v1810_v26, %s5537_s3 }
0x16c8   :  { %v1628_v27 = vpop.permute.xlu0 %1627 }
0x16c9   :  { %4478 = vmatmul.mubr.msk.f32.vlgmr.msra.gmra.mrb[16].mxu0 %vm277_vm2, %v1628_v27 }
0x16ca   :  { %4863 = vmatpush3.bf16.msra.mxu0 %v5939_v46  ;;  %4499 = vmatprep.mubr.msk.f32.mxu0 %vm5534_vm0, %v5535_v1 }
0x16cb   :  { %4864 = vmatprep.subr.bf16.mxu0 %v5533_v0 }
0x16cc   :  { %v6015_v28 = vpop.permute.xlu1 %1812 }
0x16ce   :  { %4866 = vmatpush3.bf16.msra.mxu0 %v5945_v50 }
0x16cf   :  { %4873 = vmatprep.subr.bf16.mxu0 %v5533_v0 }
0x16d1   :  { %4500 = vmatmul.mubr.msk.f32.vlgmr.msra.gmra.mrb[10].mxu0 %vm277_vm2, %v6015_v28 }
0x16d2   :  { %4875 = vmatpush3.bf16.msra.mxu0 %v5939_v46  ;;  %4521 = vmatprep.mubr.msk.f32.mxu0 %vm5534_vm0, %v5535_v1 }
0x16d3   :  { %4876 = vmatprep.subr.bf16.mxu0 %v5533_v0 }
0x16d6   :  { %4878 = vmatpush3.bf16.msra.mxu0 %v5945_v50 }
0x16d7   :  { %4885 = vmatprep.subr.bf16.mxu0 %v5533_v0 }
0x17a4   :  { %v1882_v29 = vpop.f32.mrb[10].mxu0 }
0x17a5   :  { %v5006_v30 = vadd.f32 %v5992_v54, %v1882_v29  ;;  %v4501_v31 = vpop.f32.mrb[11].mxu0 }
0x17a7   :  { %5143 = vtanh.f32 %v5006_v30  ;;  %v4046_v33 = vmul.f32 -1.442695, %v5006_v30 }
0x17a9   :  { %5145 = vpow2.f32 %v4046_v33 }
0x17b1   :  { %v5144_v32 = vpop.eup %5143 }
0x17b2   :  { %1896 = vrot.lane.b32.xlu0 %v5144_v32, %s5536_s18 }
0x17b3   :  { %v5146_v34 = vpop.eup %5145 }
0x17b4   :  { %v1890_v18 = vadd.f32 1.0, %v5146_v34 }
0x17b6   :  { %5147 = vrcp.f32 %v1890_v18 }
0x17c0   :  { %v5148_v35 = vpop.eup %5147 }
0x17c1   :  { %v1894_v40 = vmul.f32 %v5148_v35, %v1804_v21 }
0x1824   :  { %v1897_v36 = vpop.permute.xlu0 %1896 }
0x1825   :  { %v1899_v38 = vmul.f32 %v5148_v35, %v1897_v36 }
0x1827   :  { %1901 = vrot.lane.b32.xlu1 %v1899_v38, %s5537_s3 }
0x1899   :  { %v1902_v41 = vpop.permute.xlu1 %1901 }
0x189a   :  { %v1904_v42 = vadd.f32 %v1902_v41, %v1894_v40 }
0x189c   :  { %5149 = vtanh.f32 %v1904_v42 }
0x18a6   :  { %v5150_v43 = vpop.eup %5149 }
0x18a7   :  { %1907 = vrot.lane.b32.xlu0 %v5150_v43, %s5536_s18 }
0x1919   :  { %v1908_v44 = vpop.permute.xlu0 %1907 }
0x191a   :  { %v1910_v45 = vmul.f32 %v5148_v35, %v1908_v44 }
0x191c   :  { %1912 = vrot.lane.b32.xlu1 %v1910_v45, %s5537_s3 }
0x198e   :  { %v6030_v47 = vpop.permute.xlu1 %1912 }
0x198f   :  { %4511 = vmatmul.mubr.msk.f32.vlgmr.msra.gmra.mrb[10].mxu1 %vm277_vm2, %v6030_v47 }
0x1990   :  { %4881 = vmatpush3.bf16.msra.mxu1 %v5939_v46  ;;  %4532 = vmatprep.mubr.msk.f32.mxu1 %vm5534_vm0, %v5535_v1 }
0x1991   :  { %4882 = vmatprep.subr.bf16.mxu1 %v5533_v0 }
0x1994   :  { %4884 = vmatpush3.bf16.msra.mxu1 %v5945_v50 }
0x1995   :  { %4891 = vmatprep.subr.bf16.mxu1 %v5533_v0 }
0x1a62   :  { %v1982_v48 = vpop.f32.mrb[10].mxu1 }
0x1a63   :  { %v5007_v49 = vadd.f32 %v5992_v54, %v1982_v48  ;;  %v4512_v51 = vpop.f32.mrb[11].mxu1 }
0x1a65   :  { %5151 = vtanh.f32 %v5007_v49  ;;  %v4048_v39 = vmul.f32 -1.442695, %v5007_v49 }
0x1a67   :  { %5153 = vpow2.f32 %v4048_v39 }
0x1a6f   :  { %v5152_v57 = vpop.eup %5151 }
0x1a70   :  { %1996 = vrot.lane.b32.xlu0 %v5152_v57, %s5536_s18 }
0x1a71   :  { %v5154_v52 = vpop.eup %5153 }
0x1a72   :  { %v1990_v53 = vadd.f32 1.0, %v5154_v52 }
0x1a74   :  { %5155 = vrcp.f32 %v1990_v53 }
0x1a7e   :  { %v5156_v55 = vpop.eup %5155 }
0x1a7f   :  { %v1994_v59 = vmul.f32 %v5156_v55, %v1904_v42 }
0x1ae2   :  { %v1997_v56 = vpop.permute.xlu0 %1996 }
0x1ae3   :  { %v1999_v58 = vmul.f32 %v5156_v55, %v1997_v56  ;;  %v2511_v56 = vld [vmem:[%s6318_s7] sm:$0xff] }
0x1ae5   :  { %2001 = vrot.lane.b32.xlu1 %v1999_v58, %s5537_s3  ;;  %v2512_v58 = vld [vmem:[%s6318_s7 + $0x8] sm:$0xff] }
0x1b57   :  { %v2002_v60 = vpop.permute.xlu1 %2001 }
0x1b58   :  { %v2004_v61 = vadd.f32 %v2002_v60, %v1994_v59  ;;  %v6093_v59 = vpack.c.bf16 %v2512_v58, %v2511_v56  ;;  %v2513_v60 = vld [vmem:[%s6318_s7 + $0x10] sm:$0xff] }
0x1b5a   :  { %5157 = vtanh.f32 %v2004_v61 }
0x1b64   :  { %v5158_v16 = vpop.eup %5157 }
0x1b65   :  { %2007 = vrot.lane.b32.xlu0 %v5158_v16, %s5536_s18 }
0x1bd7   :  { %v2008_v62 = vpop.permute.xlu0 %2007 }
0x1bd8   :  { %v2010_v63 = vmul.f32 %v5156_v55, %v2008_v62 }
0x1bda   :  { %2012 = vrot.lane.b32.xlu1 %v2010_v63, %s5537_s3 }
0x1c4c   :  { %v6045_v2 = vpop.permute.xlu1 %2012 }
0x1c4d   :  { %4522 = vmatmul.mubr.msk.f32.vlgmr.msra.gmra.mrb[12].mxu0 %vm277_vm2, %v6045_v2 }
0x1c4e   :  { %4887 = vmatpush3.bf16.msra.mxu0 %v5939_v46  ;;  %4543 = vmatprep.mubr.msk.f32.mxu0 %vm5534_vm0, %v5535_v1 }
0x1c4f   :  { %4888 = vmatprep.subr.bf16.mxu0 %v5533_v0 }
0x1c52   :  { %4890 = vmatpush3.bf16.msra.mxu0 %v5945_v50 }
0x1c53   :  { %4897 = vmatprep.subr.bf16.mxu0 %v5533_v0 }
0x1d20   :  { %v2082_v8 = vpop.f32.mrb[12].mxu0 }
0x1d21   :  { %v5008_v3 = vadd.f32 %v5992_v54, %v2082_v8  ;;  %v4523_v4 = vpop.f32.mrb[13].mxu0 }
0x1d23   :  { %5159 = vtanh.f32 %v5008_v3  ;;  %v4050_v6 = vmul.f32 -1.442695, %v5008_v3 }
0x1d25   :  { %5161 = vpow2.f32 %v4050_v6 }
0x1d2d   :  { %v5160_v5 = vpop.eup %5159 }
0x1d2e   :  { %2096 = vrot.lane.b32.xlu0 %v5160_v5, %s5536_s18 }
0x1d2f   :  { %v5162_v12 = vpop.eup %5161 }
0x1d30   :  { %v2090_v7 = vadd.f32 1.0, %v5162_v12 }
0x1d32   :  { %5163 = vrcp.f32 %v2090_v7 }
0x1d3c   :  { %v5164_v9 = vpop.eup %5163 }
0x1d3d   :  { %v2094_v13 = vmul.f32 %v5164_v9, %v2004_v61  ;;  %v2514_v61 = vld [vmem:[%s6318_s7 + $0x18] sm:$0xff] }
0x1d3e   :  { %v6106_v62 = vpack.c.bf16 %v2514_v61, %v2513_v60 }
0x1da0   :  { %v2097_v10 = vpop.permute.xlu0 %2096 }
0x1da1   :  { %v2099_v11 = vmul.f32 %v5164_v9, %v2097_v10 }
0x1da3   :  { %2101 = vrot.lane.b32.xlu1 %v2099_v11, %s5537_s3 }
0x1e15   :  { %v2102_v14 = vpop.permute.xlu1 %2101 }
0x1e16   :  { %v2104_v15 = vadd.f32 %v2102_v14, %v2094_v13 }
0x1e18   :  { %5165 = vtanh.f32 %v2104_v15 }
0x1e22   :  { %v5166_v17 = vpop.eup %5165 }
0x1e23   :  { %2107 = vrot.lane.b32.xlu0 %v5166_v17, %s5536_s18  ;;  %v3087_v17 = vld [vmem:[#allocation13] sm:$0xff] }
0x1e95   :  { %v2108_v20 = vpop.permute.xlu0 %2107 }
0x1e96   :  { %v2110_v21 = vmul.f32 %v5164_v9, %v2108_v20  ;;  %v3088_v20 = vld [vmem:[#allocation13 + $0x8] sm:$0xff] }
0x1e98   :  { %2112 = vrot.lane.b32.xlu1 %v2110_v21, %s5537_s3  ;;  %v6144_v21 = vpack.c.bf16 %v3088_v20, %v3087_v17 }
0x1f0a   :  { %v6060_v22 = vpop.permute.xlu1 %2112 }
0x1f0b   :  { %4533 = vmatmul.mubr.msk.f32.vlgmr.msra.gmra.mrb[12].mxu1 %vm277_vm2, %v6060_v22 }
0x1f0c   :  { %4893 = vmatpush3.bf16.msra.mxu1 %v5939_v46  ;;  %4554 = vmatprep.mubr.msk.f32.mxu1 %vm5534_vm0, %v5535_v1 }
0x1f0d   :  { %4894 = vmatprep.subr.bf16.mxu1 %v5533_v0 }
0x1f10   :  { %4896 = vmatpush3.bf16.msra.mxu1 %v5945_v50 }
0x1f11   :  { %4903 = vmatprep.subr.bf16.mxu1 %v5533_v0 }
0x1fde   :  { %v2182_v23 = vpop.f32.mrb[12].mxu1 }
0x1fdf   :  { %v5009_v24 = vadd.f32 %v5992_v54, %v2182_v23  ;;  %v4534_v25 = vpop.f32.mrb[13].mxu1  ;;  %v3089_v23 = vld [vmem:[#allocation13 + $0x10] sm:$0xff] }
0x1fe1   :  { %5167 = vtanh.f32 %v5009_v24  ;;  %v4052_v19 = vmul.f32 -1.442695, %v5009_v24  ;;  %v3090_v24 = vld [vmem:[#allocation13 + $0x18] sm:$0xff] }
0x1fe3   :  { %5169 = vpow2.f32 %v4052_v19  ;;  %v4068_v19 = vld [vmem:[%s6323_s12 + $0x4] sm:$0x3] }
0x1feb   :  { %v5168_v37 = vpop.eup %5167 }
0x1fec   :  { %2196 = vrot.lane.b32.xlu0 %v5168_v37, %s5536_s18  ;;  %v6150_v37 = vpack.c.bf16 %v3090_v24, %v3089_v23 }
0x1fed   :  { %v5170_v26 = vpop.eup %5169 }
0x1fee   :  { %v2190_v27 = vadd.f32 1.0, %v5170_v26 }
0x1ff0   :  { %5171 = vrcp.f32 %v2190_v27  ;;  %v6197_v27 = vld [vmem:[#allocation14] ss:$0 sm:$0xff] }
0x1ffa   :  { %v5172_v29 = vpop.eup %5171 }
0x1ffb   :  { %v2194_v32 = vmul.f32 %v5172_v29, %v2104_v15 }
0x205e   :  { %v2197_v30 = vpop.permute.xlu0 %2196 }
0x205f   :  { %v2199_v31 = vmul.f32 %v5172_v29, %v2197_v30 }
0x2061   :  { %2201 = vrot.lane.b32.xlu1 %v2199_v31, %s5537_s3 }
0x20d3   :  { %v2202_v33 = vpop.permute.xlu1 %2201 }
0x20d4   :  { %v2204_v34 = vadd.f32 %v2202_v33, %v2194_v32 }
0x20d6   :  { %5173 = vtanh.f32 %v2204_v34 }
0x20e0   :  { %v5174_v18 = vpop.eup %5173 }
0x20e1   :  { %2207 = vrot.lane.b32.xlu0 %v5174_v18, %s5536_s18 }
0x2153   :  { %v2208_v35 = vpop.permute.xlu0 %2207 }
0x2154   :  { %v2210_v36 = vmul.f32 %v5172_v29, %v2208_v35 }
0x2156   :  { %2212 = vrot.lane.b32.xlu1 %v2210_v36, %s5537_s3 }
0x21c8   :  { %v2213_v38 = vpop.permute.xlu1 %2212 }
0x21c9   :  { %4544 = vmatmul.mubr.msk.f32.vlgmr.msra.gmra.mrb[14].mxu0 %vm277_vm2, %v2213_v38 }
0x21ca   :  { %4899 = vmatpush3.bf16.msra.mxu0 %v5939_v46  ;;  %4565 = vmatprep.mubr.msk.f32.mxu0 %vm5534_vm0, %v5535_v1 }
0x21cb   :  { %4900 = vmatprep.subr.bf16.mxu0 %v5533_v0 }
0x21ce   :  { %4902 = vmatpush3.bf16.msra.mxu0 %v5945_v50 }
0x21cf   :  { %4909 = vmatprep.subr.bf16.mxu0 %v5533_v0 }
0x229c   :  { %v2282_v40 = vpop.f32.mrb[14].mxu0 }
0x229d   :  { %v5010_v41 = vadd.f32 %v5992_v54, %v2282_v40  ;;  %v4545_v42 = vpop.f32.mrb[15].mxu0 }
0x229f   :  { %5175 = vtanh.f32 %v5010_v41  ;;  %v4054_v44 = vmul.f32 -1.442695, %v5010_v41 }
0x22a1   :  { %5177 = vpow2.f32 %v4054_v44 }
0x22a9   :  { %v5176_v43 = vpop.eup %5175 }
0x22aa   :  { %2296 = vrot.lane.b32.xlu0 %v5176_v43, %s5536_s18 }
0x22ab   :  { %v5178_v46 = vpop.eup %5177 }
0x22ac   :  { %v2290_v45 = vadd.f32 1.0, %v5178_v46 }
0x22ae   :  { %5179 = vrcp.f32 %v2290_v45 }
0x22b8   :  { %v5180_v48 = vpop.eup %5179 }
0x22b9   :  { %v2294_v50 = vmul.f32 %v5180_v48, %v2204_v34  ;;  %v4069_v34 = vld [vmem:[%s6324_s13 + $0x4] sm:$0x3]  ;;  %s5538_s13 = smov [#allocation19]  }
0x22ba   :  { %s3999_s5 = sshll.u32 %s5538_s13, 4  ;;  %s4000_s5 = int_to_ptr.vmem [resolvable:$true] %s3999_s5 }
0x22bb   :  { %s5485_s27 = scalar_lea.vmem %s4000_s5, 32  ;;  %p5490_p11 = scmp.lt.s32.totalorder %s4000_s5, %s4000_s5 }
0x22bc   :  { %p5486_p10 = scmp.ne.s32.totalorder %s4000_s5, %s5485_s27  ;;  %p5491_p12 = scmp.lt.s32.totalorder %s5485_s27, %s5485_s27 }
0x22be   :  { %p5492_p13 = por %p5491_p12, %p5490_p11 }
0x22c0   :  { %p5493_p0 = pnand %p5492_p13, %p5486_p10 }
0x231c   :  { %v2297_v49 = vpop.permute.xlu0 %2296 }
0x231d   :  { %v2299_v51 = vmul.f32 %v5180_v48, %v2297_v49 }
0x231f   :  { %2301 = vrot.lane.b32.xlu1 %v2299_v51, %s5537_s3 }
0x2391   :  { %v2302_v57 = vpop.permute.xlu1 %2301 }
0x2392   :  { %v2304_v39 = vadd.f32 %v2302_v57, %v2294_v50 }
0x2394   :  { %5181 = vtanh.f32 %v2304_v39 }
0x239e   :  { %v5182_v52 = vpop.eup %5181 }
0x239f   :  { %2307 = vrot.lane.b32.xlu0 %v5182_v52, %s5536_s18 }
0x2411   :  { %v2308_v53 = vpop.permute.xlu0 %2307 }
0x2412   :  { %v2310_v55 = vmul.f32 %v5180_v48, %v2308_v53 }
0x2414   :  { %2312 = vrot.lane.b32.xlu1 %v2310_v55, %s5537_s3 }
0x2486   :  { %v6101_v16 = vpop.permute.xlu1 %2312 }
0x2487   :  { %4555 = vmatmul.mubr.msk.f32.vlgmr.msra.gmra.mrb[14].mxu1 %vm277_vm2, %v6101_v16 }
0x2488   :  { %4905 = vmatpush3.bf16.msra.mxu1 %v6093_v59  ;;  %4576 = vmatprep.mubr.msk.f32.mxu1 %vm5534_vm0, %v5535_v1 }
0x2489   :  { %4906 = vmatprep.subr.bf16.mxu1 %v5533_v0 }
0x248c   :  { %4908 = vmatpush3.bf16.msra.mxu1 %v6106_v62 }
0x248d   :  { %4915 = vmatprep.subr.bf16.mxu1 %v5533_v0 }
0x248f   :  { %4577 = vmatmul.mubr.msk.f32.vlgmr.msra.gmra.mrb[16].mxu1 %vm277_vm2, %v6015_v28 }
0x2490   :  { %4917 = vmatpush3.bf16.msra.mxu1 %v6093_v59  ;;  %4598 = vmatprep.mubr.msk.f32.mxu1 %vm5534_vm0, %v5535_v1 }
0x2491   :  { %4918 = vmatprep.subr.bf16.mxu1 %v5533_v0 }
0x2494   :  { %4920 = vmatpush3.bf16.msra.mxu1 %v6106_v62 }
0x2495   :  { %4927 = vmatprep.subr.bf16.mxu1 %v5533_v0 }
0x2497   :  { %4599 = vmatmul.mubr.msk.f32.vlgmr.msra.gmra.mrb[18].mxu1 %vm277_vm2, %v6045_v2 }
0x2498   :  { %4929 = vmatpush3.bf16.msra.mxu1 %v6093_v59  ;;  %4620 = vmatprep.mubr.msk.f32.mxu1 %vm5534_vm0, %v5535_v1 }
0x2499   :  { %4930 = vmatprep.subr.bf16.mxu1 %v5533_v0 }
0x249c   :  { %4932 = vmatpush3.bf16.msra.mxu1 %v6106_v62 }
0x249d   :  { %4939 = vmatprep.subr.bf16.mxu1 %v5533_v0 }
0x249f   :  { %4621 = vmatmul.mubr.msk.f32.vlgmr.msra.gmra.mrb[20].mxu1 %vm277_vm2, %v2213_v38 }
0x24a0   :  { %4941 = vmatpush3.bf16.msra.mxu1 %v6093_v59  ;;  %4642 = vmatprep.mubr.msk.f32.mxu1 %vm5534_vm0, %v5535_v1 }
0x24a1   :  { %4942 = vmatprep.subr.bf16.mxu1 %v5533_v0 }
0x24a4   :  { %4944 = vmatpush3.bf16.msra.mxu1 %v6106_v62 }
0x24a5   :  { %4951 = vmatprep.subr.bf16.mxu1 %v5533_v0 }
0x255a   :  { %v2382_v28 = vpop.f32.mrb[14].mxu1 }
0x255b   :  { %v5011_v63 = vadd.f32 %v5992_v54, %v2382_v28  ;;  %v4556_v2 = vpop.f32.mrb[15].mxu1 }
0x255d   :  { %5183 = vtanh.f32 %v5011_v63  ;;  %v4056_v3 = vmul.f32 -1.442695, %v5011_v63 }
0x255f   :  { %5185 = vpow2.f32 %v4056_v3 }
0x2567   :  { %v5184_v8 = vpop.eup %5183 }
0x2568   :  { %2396 = vrot.lane.b32.xlu0 %v5184_v8, %s5536_s18 }
0x2569   :  { %v5186_v4 = vpop.eup %5185 }
0x256a   :  { %v2390_v5 = vadd.f32 1.0, %v5186_v4 }
0x256c   :  { %5187 = vrcp.f32 %v2390_v5 }
0x2576   :  { %v5188_v6 = vpop.eup %5187 }
0x2577   :  { %v2394_v9 = vmul.f32 %v5188_v6, %v2304_v39 }
0x25da   :  { %v2397_v12 = vpop.permute.xlu0 %2396 }
0x25db   :  { %v2399_v7 = vmul.f32 %v5188_v6, %v2397_v12 }
0x25dd   :  { %2401 = vrot.lane.b32.xlu1 %v2399_v7, %s5537_s3 }
0x264f   :  { %v2402_v10 = vpop.permute.xlu1 %2401 }
0x2650   :  { %v6139_v11 = vadd.f32 %v2402_v10, %v2394_v9 }
0x2652   :  { %5189 = vtanh.f32 %v6139_v11 }
0x265c   :  { %v5190_v13 = vpop.eup %5189 }
0x265d   :  { %2407 = vrot.lane.b32.xlu0 %v5190_v13, %s5536_s18 }
0x26cf   :  { %v2408_v14 = vpop.permute.xlu0 %2407 }
0x26d0   :  { %v2410_v15 = vmul.f32 %v5188_v6, %v2408_v14 }
0x26d2   :  { %2412 = vrot.lane.b32.xlu1 %v2410_v15, %s5537_s3 }
0x2744   :  { %v2413_v25 = vpop.permute.xlu1 %2412 }
0x2745   :  { %4566 = vmatmul.mubr.msk.f32.vlgmr.msra.gmra.mrb[16].mxu0 %vm277_vm2, %v2413_v25  ;;  %4643 = vmatmul.mubr.msk.f32.vlgmr.msra.gmra.mrb[22].mxu1 %vm277_vm2, %v2413_v25 }
0x2746   :  { %4911 = vmatpush3.bf16.msra.mxu0 %v6093_v59  ;;  %4953 = vmatpush3.bf16.msra.mxu1 %v6144_v21 }
0x2747   :  { %4912 = vmatprep.subr.bf16.mxu0 %v5533_v0  ;;  %4954 = vmatprep.subr.bf16.mxu1 %v5533_v0 }
0x2748   :  { %4587 = vmatprep.mubr.msk.f32.mxu0 %vm5534_vm0, %v5535_v1  ;;  %4664 = vmatprep.mubr.msk.f32.mxu1 %vm5534_vm0, %v5535_v1 }
0x274a   :  { %4914 = vmatpush3.bf16.msra.mxu0 %v6106_v62  ;;  %4956 = vmatpush3.bf16.msra.mxu1 %v6150_v37 }
0x274b   :  { %4921 = vmatprep.subr.bf16.mxu0 %v5533_v0  ;;  %4963 = vmatprep.subr.bf16.mxu1 %v5533_v0 }
0x274d   :  { %4588 = vmatmul.mubr.msk.f32.vlgmr.msra.gmra.mrb[18].mxu0 %vm277_vm2, %v6030_v47  ;;  %4665 = vmatmul.mubr.msk.f32.vlgmr.msra.gmra.mrb[16].mxu1 %vm277_vm2, %v4068_v19 }
0x274e   :  { %4923 = vmatpush3.bf16.msra.mxu0 %v6093_v59  ;;  %4609 = vmatprep.mubr.msk.f32.mxu0 %vm5534_vm0, %v5535_v1 }
0x274f   :  { %4924 = vmatprep.subr.bf16.mxu0 %v5533_v0  ;;  %4965 = vmatpush3.bf16.msra.mxu1 %v6144_v21 }
0x2750   :  { %4966 = vmatprep.subr.bf16.mxu1 %v5533_v0  ;;  %4686 = vmatprep.mubr.msk.f32.mxu1 %vm5534_vm0, %v5535_v1 }
0x2752   :  { %4926 = vmatpush3.bf16.msra.mxu0 %v6106_v62 }
0x2753   :  { %4933 = vmatprep.subr.bf16.mxu0 %v5533_v0  ;;  %4968 = vmatpush3.bf16.msra.mxu1 %v6150_v37 }
0x2754   :  { %4975 = vmatprep.subr.bf16.mxu1 %v5533_v0 }
0x2755   :  { %4610 = vmatmul.mubr.msk.f32.vlgmr.msra.gmra.mrb[20].mxu0 %vm277_vm2, %v6060_v22 }
0x2756   :  { %4935 = vmatpush3.bf16.msra.mxu0 %v6093_v59  ;;  %4631 = vmatprep.mubr.msk.f32.mxu0 %vm5534_vm0, %v5535_v1 }
0x2757   :  { %4936 = vmatprep.subr.bf16.mxu0 %v5533_v0 }
0x275a   :  { %4938 = vmatpush3.bf16.msra.mxu0 %v6106_v62 }
0x275b   :  { %4945 = vmatprep.subr.bf16.mxu0 %v5533_v0 }
0x275d   :  { %4632 = vmatmul.mubr.msk.f32.vlgmr.msra.gmra.mrb[22].mxu0 %vm277_vm2, %v6101_v16 }
0x275e   :  { %4947 = vmatpush3.bf16.msra.mxu0 %v6093_v59  ;;  %4653 = vmatprep.mubr.msk.f32.mxu0 %vm5534_vm0, %v5535_v1 }
0x275f   :  { %4948 = vmatprep.subr.bf16.mxu0 %v5533_v0 }
0x2762   :  { %4950 = vmatpush3.bf16.msra.mxu0 %v6106_v62 }
0x2763   :  { %4957 = vmatprep.subr.bf16.mxu0 %v5533_v0 }
0x2818   :  { %v2482_v47 = vpop.f32.mrb[16].mxu0 }
0x2819   :  { %v5012_v22 = vadd.f32 %v5992_v54, %v2482_v47  ;;  %v4567_v26 = vpop.f32.mrb[17].mxu0 }
0x281b   :  { %5191 = vtanh.f32 %v5012_v22  ;;  %v4058_v54 = vmul.f32 -1.442695, %v5012_v22 }
0x2820   :  { %v3164_v29 = vpop.f32.mrb[16].mxu1 }
0x2821   :  { %v5013_v30 = vadd.f32 %v6197_v27, %v3164_v29  ;;  %v4666_v31 = vpop.f32.mrb[17].mxu1 }
0x2823   :  { %5193 = vtanh.f32 %v5013_v30  ;;  %v4071_v18 = vmul.f32 -1.442695, %v5013_v30 }
0x2824   :  { %5195 = vpow2.f32 %v4058_v54 }
0x2825   :  { %v5192_v32 = vpop.eup %5191  ;;  %5197 = vpow2.f32 %v4071_v18 }
0x2826   :  { %2496 = vrot.lane.b32.xlu0 %v5192_v32, %s5536_s18 }
0x282d   :  { %v5194_v33 = vpop.eup %5193 }
0x282e   :  { %3182 = vrot.lane.b32.xlu1 %v5194_v33, %s5536_s18  ;;  %v5196_v35 = vpop.eup %5195 }
0x282f   :  { %v2490_v36 = vadd.f32 1.0, %v5196_v35  ;;  %v5198_v38 = vpop.eup %5197 }
0x2830   :  { %v3172_v40 = vadd.f32 1.0, %v5198_v38 }
0x2831   :  { %5199 = vrcp.f32 %v2490_v36 }
0x2832   :  { %3177 = vrot.lane.b32.xlu1 %v4069_v34, %s5537_s3  ;;  %5201 = vrcp.f32 %v3172_v40 }
0x283b   :  { %v5200_v41 = vpop.eup %5199 }
0x283c   :  { %v5202_v44 = vpop.eup %5201  ;;  %v2494_v48 = vmul.f32 %v5200_v41, %v6139_v11 }
0x2898   :  { %v2497_v42 = vpop.permute.xlu0 %2496 }
0x2899   :  { %v2499_v43 = vmul.f32 %v5200_v41, %v2497_v42 }
0x289b   :  { %2501 = vrot.lane.b32.xlu0 %v2499_v43, %s5537_s3 }
0x28a0   :  { %v3183_v46 = vpop.permute.xlu1 %3182 }
0x28a1   :  { %v3185_v45 = vmul.f32 %v5202_v44, %v3183_v46 }
0x28a3   :  { %3187 = vrot.lane.b32.xlu0 %v3185_v45, %s5537_s3 }
0x28a4   :  { %v3178_v50 = vpop.permute.xlu1 %3177 }
0x28a5   :  { %v3180_v57 = vmul.f32 %v5202_v44, %v3178_v50 }
0x290d   :  { %v2502_v49 = vpop.permute.xlu0 %2501 }
0x290e   :  { %v2504_v51 = vadd.f32 %v2502_v49, %v2494_v48 }
0x2910   :  { %5203 = vtanh.f32 %v2504_v51 }
0x2915   :  { %v3188_v39 = vpop.permute.xlu0 %3187 }
0x2916   :  { %v3190_v52 = vadd.f32 %v3188_v39, %v3180_v57 }
0x2918   :  { %5205 = vtanh.f32 %v3190_v52 }
0x291a   :  { %v5204_v53 = vpop.eup %5203 }
0x291b   :  { %2507 = vrot.lane.b32.xlu1 %v5204_v53, %s5536_s18 }
0x2922   :  { %v5206_v55 = vpop.eup %5205 }
0x2923   :  { %3193 = vrot.lane.b32.xlu0 %v5206_v55, %s5536_s18 }
0x298d   :  { %v2508_v56 = vpop.permute.xlu1 %2507 }
0x298e   :  { %v2510_v58 = vmul.f32 %v5200_v41, %v2508_v56 }
0x2990   :  { %3013 = vrot.lane.b32.xlu1 %v2510_v58, %s5537_s3 }
0x2995   :  { %v3194_v59 = vpop.permute.xlu0 %3193 }
0x2996   :  { %v6212_v60 = vmul.f32 %v5202_v44, %v3194_v59 }
0x2998   :  { %3198 = vrot.lane.b32.xlu0 %v6212_v60, %s5537_s3 }
0x2a02   :  { %v3014_v61 = vpop.permute.xlu1 %3013 }
0x2a03   :  { %4654 = vmatmul.mubr.msk.f32.vlgmr.msra.gmra.mrb[24].mxu0 %vm277_vm2, %v3014_v61 }
0x2a04   :  { %4959 = vmatpush3.bf16.msra.mxu0 %v6144_v21  ;;  %4675 = vmatprep.mubr.msk.f32.mxu0 %vm5534_vm0, %v5535_v1 }
0x2a05   :  { %4960 = vmatprep.subr.bf16.mxu0 %v5533_v0 }
0x2a08   :  { %4962 = vmatpush3.bf16.msra.mxu0 %v6150_v37 }
0x2a09   :  { %4969 = vmatprep.subr.bf16.mxu0 %v5533_v0 }
0x2a0a   :  { %v3199_v16 = vpop.permute.xlu0 %3198 }
0x2a0b   :  { %4676 = vmatmul.mubr.msk.f32.vlgmr.msra.gmra.mrb[18].mxu0 %vm277_vm2, %v3199_v16 }
0x2a0c   :  { %4971 = vmatpush3.bf16.msra.mxu0 %v6144_v21  ;;  %4697 = vmatprep.mubr.msk.f32.mxu0 %vm5534_vm0, %v5535_v1 }
0x2a0d   :  { %4972 = vmatprep.subr.bf16.mxu0 %v5533_v0 }
0x2a10   :  { %4974 = vmatpush3.bf16.msra.mxu0 %v6150_v37 }
0x2a11   :  { %4981 = vmatprep.subr.bf16.mxu0 %v5533_v0 }
0x2ade   :  { %v3268_v62 = vpop.f32.mrb[18].mxu0 }
0x2adf   :  { %v5014_v28 = vadd.f32 %v6197_v27, %v3268_v62  ;;  %v4677_v63 = vpop.f32.mrb[19].mxu0 }
0x2ae1   :  { %5207 = vtanh.f32 %v5014_v28  ;;  %v4073_v8 = vmul.f32 -1.442695, %v5014_v28 }
0x2ae3   :  { %5209 = vpow2.f32 %v4073_v8 }
0x2aeb   :  { %v5208_v2 = vpop.eup %5207 }
0x2aec   :  { %3282 = vrot.lane.b32.xlu1 %v5208_v2, %s5536_s18 }
0x2aed   :  { %v5210_v3 = vpop.eup %5209 }
0x2aee   :  { %v3276_v4 = vadd.f32 1.0, %v5210_v3 }
0x2af0   :  { %5211 = vrcp.f32 %v3276_v4 }
0x2afa   :  { %v5212_v5 = vpop.eup %5211 }
0x2afb   :  { %v3280_v7 = vmul.f32 %v5212_v5, %v3190_v52 }
0x2b5e   :  { %v3283_v6 = vpop.permute.xlu1 %3282 }
0x2b5f   :  { %v3285_v12 = vmul.f32 %v5212_v5, %v3283_v6 }
0x2b61   :  { %3287 = vrot.lane.b32.xlu0 %v3285_v12, %s5537_s3 }
0x2bd3   :  { %v3288_v9 = vpop.permute.xlu0 %3287 }
0x2bd4   :  { %v3290_v10 = vadd.f32 %v3288_v9, %v3280_v7 }
0x2bd6   :  { %5213 = vtanh.f32 %v3290_v10 }
0x2be0   :  { %v5214_v11 = vpop.eup %5213 }
0x2be1   :  { %3293 = vrot.lane.b32.xlu1 %v5214_v11, %s5536_s18 }
0x2c53   :  { %v3294_v13 = vpop.permute.xlu1 %3293 }
0x2c54   :  { %v3296_v14 = vmul.f32 %v5212_v5, %v3294_v13 }
0x2c56   :  { %3298 = vrot.lane.b32.xlu0 %v3296_v14, %s5537_s3  ;;  %v3897_v54 = vadd.f32 %v3296_v14, %v6212_v60 }
0x2cc8   :  { %v3299_v15 = vpop.permute.xlu0 %3298 }
0x2cc9   :  { %4687 = vmatmul.mubr.msk.f32.vlgmr.msra.gmra.mrb[18].mxu1 %vm277_vm2, %v3299_v15 }
0x2cca   :  { %4977 = vmatpush3.bf16.msra.mxu1 %v6144_v21  ;;  %4708 = vmatprep.mubr.msk.f32.mxu1 %vm5534_vm0, %v5535_v1 }
0x2ccb   :  { %4978 = vmatprep.subr.bf16.mxu1 %v5533_v0 }
0x2cce   :  { %4980 = vmatpush3.bf16.msra.mxu1 %v6150_v37 }
0x2ccf   :  { %4987 = vmatprep.subr.bf16.mxu1 %v5533_v0 }
0x2d9c   :  { %v3368_v17 = vpop.f32.mrb[18].mxu1 }
0x2d9d   :  { %v5015_v20 = vadd.f32 %v6197_v27, %v3368_v17  ;;  %v4688_v23 = vpop.f32.mrb[19].mxu1 }
0x2d9f   :  { %5215 = vtanh.f32 %v5015_v20  ;;  %v4075_v25 = vmul.f32 -1.442695, %v5015_v20 }
0x2da1   :  { %5217 = vpow2.f32 %v4075_v25 }
0x2da9   :  { %v5216_v24 = vpop.eup %5215 }
0x2daa   :  { %3382 = vrot.lane.b32.xlu1 %v5216_v24, %s5536_s18 }
0x2dab   :  { %v5218_v19 = vpop.eup %5217 }
0x2dac   :  { %v3376_v47 = vadd.f32 1.0, %v5218_v19 }
0x2dae   :  { %5219 = vrcp.f32 %v3376_v47 }
0x2db8   :  { %v5220_v22 = vpop.eup %5219 }
0x2db9   :  { %v3380_v30 = vmul.f32 %v5220_v22, %v3290_v10 }
0x2e1c   :  { %v3383_v26 = vpop.permute.xlu1 %3382 }
0x2e1d   :  { %v3385_v29 = vmul.f32 %v5220_v22, %v3383_v26 }
0x2e1f   :  { %3387 = vrot.lane.b32.xlu0 %v3385_v29, %s5537_s3 }
0x2e91   :  { %v3388_v31 = vpop.permute.xlu0 %3387 }
0x2e92   :  { %v3390_v32 = vadd.f32 %v3388_v31, %v3380_v30 }
0x2e94   :  { %5221 = vtanh.f32 %v3390_v32 }
0x2e9e   :  { %v5222_v33 = vpop.eup %5221 }
0x2e9f   :  { %3393 = vrot.lane.b32.xlu1 %v5222_v33, %s5536_s18 }
0x2f11   :  { %v3394_v34 = vpop.permute.xlu1 %3393 }
0x2f12   :  { %v3396_v18 = vmul.f32 %v5220_v22, %v3394_v34 }
0x2f14   :  { %v3898_v35 = vadd.f32 %v3897_v54, %v3396_v18  ;;  %3398 = vrot.lane.b32.xlu0 %v3396_v18, %s5537_s3 }
0x2f86   :  { %v3399_v36 = vpop.permute.xlu0 %3398 }
0x2f87   :  { %4698 = vmatmul.mubr.msk.f32.vlgmr.msra.gmra.mrb[20].mxu0 %vm277_vm2, %v3399_v36 }
0x2f88   :  { %4983 = vmatpush3.bf16.msra.mxu0 %v6144_v21  ;;  %4719 = vmatprep.mubr.msk.f32.mxu0 %vm5534_vm0, %v5535_v1 }
0x2f89   :  { %4984 = vmatprep.subr.bf16.mxu0 %v5533_v0 }
0x2f8c   :  { %4986 = vmatpush3.bf16.msra.mxu0 %v6150_v37 }
0x2f8d   :  { %4993 = vmatprep.subr.bf16.mxu0 %v5533_v0 }
0x305a   :  { %v3468_v38 = vpop.f32.mrb[20].mxu0 }
0x305b   :  { %v5016_v40 = vadd.f32 %v6197_v27, %v3468_v38  ;;  %v4699_v41 = vpop.f32.mrb[21].mxu0 }
0x305d   :  { %5223 = vtanh.f32 %v5016_v40  ;;  %v4077_v43 = vmul.f32 -1.442695, %v5016_v40 }
0x305f   :  { %5225 = vpow2.f32 %v4077_v43 }
0x3067   :  { %v5224_v42 = vpop.eup %5223 }
0x3068   :  { %3482 = vrot.lane.b32.xlu1 %v5224_v42, %s5536_s18 }
0x3069   :  { %v5226_v44 = vpop.eup %5225 }
0x306a   :  { %v3476_v46 = vadd.f32 1.0, %v5226_v44 }
0x306c   :  { %5227 = vrcp.f32 %v3476_v46 }
0x3076   :  { %v5228_v45 = vpop.eup %5227 }
0x3077   :  { %v3480_v51 = vmul.f32 %v5228_v45, %v3390_v32 }
0x30da   :  { %v3483_v48 = vpop.permute.xlu1 %3482 }
0x30db   :  { %v3485_v49 = vmul.f32 %v5228_v45, %v3483_v48 }
0x30dd   :  { %3487 = vrot.lane.b32.xlu0 %v3485_v49, %s5537_s3 }
0x314f   :  { %v3488_v50 = vpop.permute.xlu0 %3487 }
0x3150   :  { %v3490_v57 = vadd.f32 %v3488_v50, %v3480_v51 }
0x3152   :  { %5229 = vtanh.f32 %v3490_v57 }
0x315c   :  { %v5230_v39 = vpop.eup %5229 }
0x315d   :  { %3493 = vrot.lane.b32.xlu1 %v5230_v39, %s5536_s18 }
0x31cf   :  { %v3494_v52 = vpop.permute.xlu1 %3493 }
0x31d0   :  { %v3496_v53 = vmul.f32 %v5228_v45, %v3494_v52 }
0x31d2   :  { %v3899_v55 = vadd.f32 %v3898_v35, %v3496_v53  ;;  %3498 = vrot.lane.b32.xlu0 %v3496_v53, %s5537_s3 }
0x3244   :  { %v3499_v56 = vpop.permute.xlu0 %3498 }
0x3245   :  { %4709 = vmatmul.mubr.msk.f32.vlgmr.msra.gmra.mrb[20].mxu1 %vm277_vm2, %v3499_v56 }
0x3246   :  { %4989 = vmatpush3.bf16.msra.mxu1 %v6144_v21  ;;  %4730 = vmatprep.mubr.msk.f32.mxu1 %vm5534_vm0, %v5535_v1 }
0x3247   :  { %4990 = vmatprep.subr.bf16.mxu1 %v5533_v0 }
0x324a   :  { %4992 = vmatpush3.bf16.msra.mxu1 %v6150_v37 }
0x324b   :  { %4999 = vmatprep.subr.bf16.mxu1 %v5533_v0 }
0x3318   :  { %v3568_v58 = vpop.f32.mrb[20].mxu1 }
0x3319   :  { %v5017_v59 = vadd.f32 %v6197_v27, %v3568_v58  ;;  %v4710_v60 = vpop.f32.mrb[21].mxu1 }
0x331b   :  { %5231 = vtanh.f32 %v5017_v59  ;;  %v4079_v16 = vmul.f32 -1.442695, %v5017_v59 }
0x331d   :  { %5233 = vpow2.f32 %v4079_v16 }
0x3325   :  { %v5232_v61 = vpop.eup %5231 }
0x3326   :  { %3582 = vrot.lane.b32.xlu1 %v5232_v61, %s5536_s18 }
0x3327   :  { %v5234_v62 = vpop.eup %5233 }
0x3328   :  { %v3576_v28 = vadd.f32 1.0, %v5234_v62  ;;  %v3905_v62 = vld [vmem:[#allocation16 + $0x8] sm:$0xff] }
0x332a   :  { %5235 = vrcp.f32 %v3576_v28  ;;  %v3906_v28 = vld [vmem:[#allocation16 + $0x10] sm:$0xff] }
0x3334   :  { %v5236_v63 = vpop.eup %5235 }
0x3335   :  { %v3580_v3 = vmul.f32 %v5236_v63, %v3490_v57 }
0x3398   :  { %v3583_v2 = vpop.permute.xlu1 %3582 }
0x3399   :  { %v3585_v8 = vmul.f32 %v5236_v63, %v3583_v2  ;;  %v3907_v2 = vld [vmem:[#allocation16 + $0x18] sm:$0xff] }
0x339b   :  { %3587 = vrot.lane.b32.xlu0 %v3585_v8, %s5537_s3  ;;  %v5003_v8 = vpack.c.bf16 %v3907_v2, %v3906_v28 }
0x340d   :  { %v3588_v4 = vpop.permute.xlu0 %3587 }
0x340e   :  { %v3590_v5 = vadd.f32 %v3588_v4, %v3580_v3 }
0x3410   :  { %5237 = vtanh.f32 %v3590_v5 }
0x341a   :  { %v5238_v6 = vpop.eup %5237 }
0x341b   :  { %3593 = vrot.lane.b32.xlu1 %v5238_v6, %s5536_s18 }
0x348d   :  { %v3594_v12 = vpop.permute.xlu1 %3593 }
0x348e   :  { %v3596_v7 = vmul.f32 %v5236_v63, %v3594_v12 }
0x3490   :  { %v3900_v9 = vadd.f32 %v3899_v55, %v3596_v7  ;;  %3598 = vrot.lane.b32.xlu0 %v3596_v7, %s5537_s3  ;;  %v4086_v7 = vld [vmem:[#allocation17] ss:$0 sm:$0xff] }
0x3502   :  { %v3599_v10 = vpop.permute.xlu0 %3598 }
0x3503   :  { %4720 = vmatmul.mubr.msk.f32.vlgmr.msra.gmra.mrb[22].mxu0 %vm277_vm2, %v3599_v10 }
0x3504   :  { %4995 = vmatpush3.bf16.msra.mxu0 %v6144_v21  ;;  %4741 = vmatprep.mubr.msk.f32.mxu0 %vm5534_vm0, %v5535_v1 }
0x3505   :  { %4996 = vmatprep.subr.bf16.mxu0 %v5533_v0 }
0x3508   :  { %4998 = vmatpush3.bf16.msra.mxu0 %v6150_v37 }
0x35d6   :  { %v3668_v11 = vpop.f32.mrb[22].mxu0 }
0x35d7   :  { %v5018_v13 = vadd.f32 %v6197_v27, %v3668_v11  ;;  %v4721_v14 = vpop.f32.mrb[23].mxu0 }
0x35d9   :  { %5239 = vtanh.f32 %v5018_v13  ;;  %v4081_v17 = vmul.f32 -1.442695, %v5018_v13 }
0x35db   :  { %5241 = vpow2.f32 %v4081_v17 }
0x35e3   :  { %v5240_v15 = vpop.eup %5239 }
0x35e4   :  { %3682 = vrot.lane.b32.xlu1 %v5240_v15, %s5536_s18 }
0x35e5   :  { %v5242_v20 = vpop.eup %5241 }
0x35e6   :  { %v3676_v23 = vadd.f32 1.0, %v5242_v20 }
0x35e8   :  { %5243 = vrcp.f32 %v3676_v23 }
0x35f2   :  { %v5244_v21 = vpop.eup %5243 }
0x35f3   :  { %v3680_v19 = vmul.f32 %v5244_v21, %v3590_v5 }
0x3656   :  { %v3683_v24 = vpop.permute.xlu1 %3682 }
0x3657   :  { %v3685_v25 = vmul.f32 %v5244_v21, %v3683_v24 }
0x3659   :  { %3687 = vrot.lane.b32.xlu0 %v3685_v25, %s5537_s3 }
0x36cb   :  { %v3688_v37 = vpop.permute.xlu0 %3687 }
0x36cc   :  { %v3690_v47 = vadd.f32 %v3688_v37, %v3680_v19 }
0x36ce   :  { %5245 = vtanh.f32 %v3690_v47 }
0x36d8   :  { %v5246_v22 = vpop.eup %5245 }
0x36d9   :  { %3693 = vrot.lane.b32.xlu1 %v5246_v22, %s5536_s18 }
0x374b   :  { %v3694_v26 = vpop.permute.xlu1 %3693 }
0x374c   :  { %v3696_v29 = vmul.f32 %v5244_v21, %v3694_v26 }
0x374e   :  { %v3901_v30 = vadd.f32 %v3900_v9, %v3696_v29  ;;  %3698 = vrot.lane.b32.xlu0 %v3696_v29, %s5537_s3 }
0x37c0   :  { %v3699_v31 = vpop.permute.xlu0 %3698 }
0x37c1   :  { %4731 = vmatmul.mubr.msk.f32.vlgmr.msra.gmra.mrb[22].mxu1 %vm277_vm2, %v3699_v31 }
0x37c2   :  { %4752 = vmatprep.mubr.msk.f32.mxu1 %vm5534_vm0, %v5535_v1 }
0x3894   :  { %v3768_v32 = vpop.f32.mrb[22].mxu1 }
0x3895   :  { %v5019_v33 = vadd.f32 %v6197_v27, %v3768_v32  ;;  %v4732_v34 = vpop.f32.mrb[23].mxu1 }
0x3897   :  { %5247 = vtanh.f32 %v5019_v33  ;;  %v4083_v18 = vmul.f32 -1.442695, %v5019_v33 }
0x3899   :  { %5249 = vpow2.f32 %v4083_v18 }
0x38a1   :  { %v5248_v54 = vpop.eup %5247 }
0x38a2   :  { %3782 = vrot.lane.b32.xlu1 %v5248_v54, %s5536_s18 }
0x38a3   :  { %v5250_v35 = vpop.eup %5249 }
0x38a4   :  { %v3776_v36 = vadd.f32 1.0, %v5250_v35 }
0x38a6   :  { %5251 = vrcp.f32 %v3776_v36 }
0x38b0   :  { %v5252_v38 = vpop.eup %5251 }
0x38b1   :  { %v3780_v42 = vmul.f32 %v5252_v38, %v3690_v47 }
0x3914   :  { %v3783_v40 = vpop.permute.xlu1 %3782 }
0x3915   :  { %v3785_v41 = vmul.f32 %v5252_v38, %v3783_v40 }
0x3917   :  { %3787 = vrot.lane.b32.xlu0 %v3785_v41, %s5537_s3 }
0x3989   :  { %v3788_v1 = vpop.permute.xlu0 %3787 }
0x398a   :  { %v3790_v43 = vadd.f32 %v3788_v1, %v3780_v42 }
0x398c   :  { %5253 = vtanh.f32 %v3790_v43 }
0x3996   :  { %v5254_v44 = vpop.eup %5253 }
0x3997   :  { %3793 = vrot.lane.b32.xlu1 %v5254_v44, %s5536_s18 }
0x3a09   :  { %v3794_v46 = vpop.permute.xlu1 %3793 }
0x3a0a   :  { %v3796_v45 = vmul.f32 %v5252_v38, %v3794_v46 }
0x3a0c   :  { %v3902_v48 = vadd.f32 %v3901_v30, %v3796_v45  ;;  %3798 = vrot.lane.b32.xlu0 %v3796_v45, %s5537_s3 }
0x3a7e   :  { %v3799_v49 = vpop.permute.xlu0 %3798 }
0x3a7f   :  { %4742 = vmatmul.mubr.msk.f32.vlgmr.msra.gmra.mrb[24].mxu0 %vm277_vm2, %v3799_v49 }
0x3b52   :  { %v3868_v51 = vpop.f32.mrb[24].mxu0 }
0x3b53   :  { %v5020_v50 = vadd.f32 %v6197_v27, %v3868_v51  ;;  %v4743_v57 = vpop.f32.mrb[25].mxu0  ;;  %v3904_v27 = vld [vmem:[#allocation16] sm:$0xff] }
0x3b54   :  { %v5000_v63 = vpack.c.bf16 %v3905_v62, %v3904_v27 }
0x3b55   :  { %5255 = vtanh.f32 %v5020_v50  ;;  %v4085_v52 = vmul.f32 -1.442695, %v5020_v50 }
0x3b56   :  { %5001 = vmatpush3.bf16.msra.mxu1 %v5000_v63 }
0x3b57   :  { %5257 = vpow2.f32 %v4085_v52  ;;  %5002 = vmatprep.subr.bf16.mxu1 %v5533_v0 }
0x3b5a   :  { %5004 = vmatpush3.bf16.msra.mxu1 %v5003_v8 }
0x3b5f   :  { %v5256_v39 = vpop.eup %5255 }
0x3b60   :  { %3882 = vrot.lane.b32.xlu1 %v5256_v39, %s5536_s18 }
0x3b61   :  { %v5258_v53 = vpop.eup %5257 }
0x3b62   :  { %v3876_v55 = vadd.f32 1.0, %v5258_v53 }
0x3b64   :  { %5259 = vrcp.f32 %v3876_v55 }
0x3b6e   :  { %v5260_v56 = vpop.eup %5259 }
0x3b6f   :  { %v3880_v60 = vmul.f32 %v5260_v56, %v3790_v43 }
0x3bd2   :  { %v3883_v58 = vpop.permute.xlu1 %3882 }
0x3bd3   :  { %v3885_v59 = vmul.f32 %v5260_v56, %v3883_v58 }
0x3bd5   :  { %3887 = vrot.lane.b32.xlu0 %v3885_v59, %s5537_s3 }
0x3c47   :  { %v3888_v61 = vpop.permute.xlu0 %3887 }
0x3c48   :  { %v3890_v16 = vadd.f32 %v3888_v61, %v3880_v60 }
0x3c4a   :  { %5261 = vtanh.f32 %v3890_v16 }
0x3c54   :  { %v5262_v3 = vpop.eup %5261 }
0x3c55   :  { %3893 = vrot.lane.b32.xlu1 %v5262_v3, %s5536_s18 }
0x3cc7   :  { %v3894_v4 = vpop.permute.xlu1 %3893 }
0x3cc8   :  { %v3896_v5 = vmul.f32 %v5260_v56, %v3894_v4 }
0x3cca   :  { %v3903_v6 = vadd.f32 %v3902_v48, %v3896_v5 }
0x3ccc   :  { %3916 = vrot.lane.b32.xlu0 %v3903_v6, %s5537_s3 }
0x3d3e   :  { %v3917_v12 = vpop.permute.xlu0 %3916 }
0x3d3f   :  { %4753 = vmatmul.mubr.msk.f32.vlgmr.msra.gmra.mrb[24].mxu1 %vm277_vm2, %v3917_v12 }
0x3e12   :  { %v3986_v9 = vpop.f32.mrb[24].mxu1 }
0x3e13   :  { %v3987_v10 = vadd.f32 %v4086_v7, %v3986_v9  ;;  %v4754_v11 = vpop.f32.mrb[25].mxu1 }
0x3e15   :  { %5263 = vtanh.f32 %v3987_v10 }
0x3e1f   :  { %v5264_v0 = vpop.eup %5263 }
0x3e20   :  { %3992 = vst.msk [vmem:[#allocation19] sm:$0x3] %vm3991_vm3, %v5264_v0 }
0x3e21   :  { %5496 = shalt.err (!%p5493_p0)
}
0x3e22   :  { %s5497_s25 = scalar_lea.hbm %s6325_s14, 32 }
0x3e23   :  { %p5498_p1 = scmp.ne.s32.totalorder %s6325_s14, %s5497_s25  ;;  %p5501_p2 = scmp.lt.u32.totalorder %s5497_s25, %s6325_s14 }
0x3e25   :  { %p5503_p3 = pnand %p5501_p2, %p5498_p1 }
0x3e27   :  { %5506 = shalt.err (!%p5503_p3)
}
0x3e28   :  { %4002 = dma.vmem_to_hbm [thread:$0]  %s4000_s5, 32, %s6325_s14, [#allocation4]  }
0x3e29   :  { %5519 = dma.done.wait [#allocation4], 32  }
0x3e2a   :  { %5520 = vsyncadd [#allocation4], 4294967264 }
0x3e2b   :  { %4006 = vsyncpa [#allocation3], 1 }
0x3e2c   :  { %4007 = vsyncpa [#allocation6], 1 }
0x3e2d   :  { %4008 = vsyncpa [#allocation9], 1 }
0x3e2e   :  { %4009 = vsyncpa [#allocation12], 1 }
0x3e2f   :  { %4010 = vsyncpa [#allocation15], 1 }
0x3e30   :  { %4011 = vsyncpa [#allocation18], 1 }
0x3e31   :  { %4012 = vsyncpa [#allocation4], 1 }

</bundles_post_ra>
